<compile_context>
chip_gen: v5e
topology: v5e:2x2
jax: 0.10.0
libtpu: 0.0.40
codegen_flags: <defaults>
</compile_context>

<pallas_src>
import functools

import jax
import jax.numpy as jnp
from jax.experimental import pallas as pl
from jax.experimental.pallas import tpu as pltpu  # noqa: F401  (kept for TPU-specific tuning)

# ----------------------------- model dims -----------------------------------
X_DIM = 256      # X_dim (flattened input size)
HIDDEN = 512     # fixed by the module
Z_DIM = 32       # z_dim
BATCH = 8
BN_EPS = 1e-5
LRELU_SLOPE = 0.2

HEAD = 2 * Z_DIM          # fused mu|logvar head width (64 lanes)
OUT_W = 4 * Z_DIM         # padded lane-dense output width (128 lanes)
N_VEC_ROWS = 8            # packed small-vector params, sublane-aligned


# ------------------------------ kernel --------------------------------------
def encoder_kernel(x_ref, w1_ref, w2_ref, whead_ref, vecs_ref, eps_ref, out_ref):
    x = x_ref[...]                                              # [B, X_DIM] f32

    # packed small params: rows 0..3 = b1, b2, gamma, beta; row 4[:HEAD] = head bias
    b1 = vecs_ref[0:1, :]
    b2 = vecs_ref[1:2, :]
    gamma = vecs_ref[2:3, :]
    beta = vecs_ref[3:4, :]
    b_head = vecs_ref[4:5, 0:HEAD]

    # --- Linear(X_dim, 512) + LeakyReLU(0.2) ---
    # bf16 weights are promoted to f32 inside the dot; accumulation in f32.
    h1 = jnp.dot(x, w1_ref[...], preferred_element_type=jnp.float32) + b1
    h1 = jnp.where(h1 > 0, h1, LRELU_SLOPE * h1)

    # --- Linear(512, 512) ---
    h2 = jnp.dot(h1, w2_ref[...], preferred_element_type=jnp.float32) + b2

    # --- BatchNorm1d(512), training mode (batch statistics, biased variance) ---
    mean = jnp.mean(h2, axis=0, keepdims=True)                  # [1, HIDDEN]
    centered = h2 - mean
    var = jnp.mean(centered * centered, axis=0, keepdims=True)  # biased (÷N)
    inv_std = jax.lax.rsqrt(var + BN_EPS)
    hbn = centered * inv_std * gamma + beta

    # --- LeakyReLU(0.2) ---
    h = jnp.where(hbn > 0, hbn, LRELU_SLOPE * hbn)

    # --- fused heads: [mu | logvar] in one MXU pass ---
    head = jnp.dot(h, whead_ref[...], preferred_element_type=jnp.float32) + b_head
    mu = head[:, :Z_DIM]
    logvar = head[:, Z_DIM:]

    # --- reparameterization: z = eps * exp(logvar/2) + mu ---
    std = jnp.exp(logvar * 0.5)
    z = eps_ref[...] * std + mu

    # single lane-dense [B, 128] store: [ z | mu | logvar | 0-pad ]
    out_ref[...] = jnp.concatenate([z, head, jnp.zeros_like(z)], axis=-1)


# ------------------------------ wrapper --------------------------------------
@functools.partial(jax.jit, static_argnames=())
def encoder_forward(x, packed, eps):
    """packed = dict(w1, w2, w_head [bf16], vecs [8, HIDDEN] f32)."""
    B = x.shape[0]
    full2d = lambda shape: pl.BlockSpec(shape, lambda: (0, 0))

    in_specs = [
        full2d((B, X_DIM)),              # x
        full2d((X_DIM, HIDDEN)),         # W1 (bf16)
        full2d((HIDDEN, HIDDEN)),        # W2 (bf16)
        full2d((HIDDEN, HEAD)),          # Wmu|Wlv fused (bf16)
        full2d((N_VEC_ROWS, HIDDEN)),    # packed vector params (f32)
        full2d((B, Z_DIM)),              # eps
    ]
    out_specs = full2d((B, OUT_W))
    out_shape = jax.ShapeDtypeStruct((B, OUT_W), jnp.float32)

    out = pl.pallas_call(
        encoder_kernel,
        out_shape=out_shape,
        in_specs=in_specs,
        out_specs=out_specs,
    )(x, packed["w1"], packed["w2"], packed["w_head"], packed["vecs"], eps)

    z = out[:, 0:Z_DIM]
    mu = out[:, Z_DIM:2 * Z_DIM]
    logvar = out[:, 2 * Z_DIM:3 * Z_DIM]
    return z, mu, logvar


# --------------------------- param init (deterministic) ----------------------
def init_params(key):
    """PyTorch-Linear-like init: U(-1/sqrt(fan_in), 1/sqrt(fan_in))."""
    def linear(key, fan_in, fan_out):
        kw, kb = jax.random.split(key)
        bound = 1.0 / jnp.sqrt(fan_in)
        w = jax.random.uniform(kw, (fan_in, fan_out), jnp.float32, -bound, bound)
        b = jax.random.uniform(kb, (1, fan_out), jnp.float32, -bound, bound)
        return w, b

    k1, k2, k3, k4 = jax.random.split(key, 4)
    w1, b1 = linear(k1, X_DIM, HIDDEN)
    w2, b2 = linear(k2, HIDDEN, HIDDEN)
    wmu, bmu = linear(k3, HIDDEN, Z_DIM)
    wlv, blv = linear(k4, HIDDEN, Z_DIM)
    return dict(
        w1=w1, b1=b1, w2=w2, b2=b2,
        gamma=jnp.ones((1, HIDDEN), jnp.float32),
        beta=jnp.zeros((1, HIDDEN), jnp.float32),
        wmu=wmu, bmu=bmu, wlv=wlv, blv=blv,
    )


def pack_params(p):
    """Pack raw params into the kernel's fused/quantized layout."""
    w1 = p["w1"].astype(jnp.bfloat16)
    w2 = p["w2"].astype(jnp.bfloat16)
    w_head = jnp.concatenate([p["wmu"], p["wlv"]], axis=1).astype(jnp.bfloat16)

    b_head = jnp.concatenate([p["bmu"], p["blv"]], axis=1)            # [1, HEAD]
    b_head_padded = jnp.zeros((1, HIDDEN), jnp.float32).at[:, :HEAD].set(b_head)
    vecs = jnp.concatenate(
        [p["b1"], p["b2"], p["gamma"], p["beta"], b_head_padded,
         jnp.zeros((N_VEC_ROWS - 5, HIDDEN), jnp.float32)],
        axis=0,
    )                                                                 # [8, HIDDEN]
    return dict(w1=w1, w2=w2, w_head=w_head, vecs=vecs)


def reference_forward(x, p, eps):
    """Pure-JAX reference (uses the same bf16-stored weights as the kernel)."""
    lrelu = lambda v: jnp.where(v > 0, v, LRELU_SLOPE * v)
    w1 = p["w1"].astype(jnp.bfloat16).astype(jnp.float32)
    w2 = p["w2"].astype(jnp.bfloat16).astype(jnp.float32)
    wmu = p["wmu"].astype(jnp.bfloat16).astype(jnp.float32)
    wlv = p["wlv"].astype(jnp.bfloat16).astype(jnp.float32)

    h = lrelu(x @ w1 + p["b1"])
    h2 = h @ w2 + p["b2"]
    mean = h2.mean(axis=0, keepdims=True)
    var = ((h2 - mean) ** 2).mean(axis=0, keepdims=True)
    h = lrelu((h2 - mean) / jnp.sqrt(var + BN_EPS) * p["gamma"] + p["beta"])
    mu = h @ wmu + p["bmu"]
    logvar = h @ wlv + p["blv"]
    return eps * jnp.exp(logvar / 2) + mu, mu, logvar


# --------------------------------- main --------------------------------------
if __name__ == "__main__":
    key = jax.random.PRNGKey(0)
    kx, keps, kparam = jax.random.split(key, 3)

    x = jax.random.normal(kx, (BATCH, X_DIM), jnp.float32)
    eps = jax.random.normal(keps, (BATCH, Z_DIM), jnp.float32)  # reparam noise
    params = init_params(kparam)
    packed = pack_params(params)

    z, mu, logvar = encoder_forward(x, packed, eps)
    jax.block_until_ready(z)

    z_ref, mu_ref, lv_ref = reference_forward(x, params, eps)
    assert jnp.allclose(z, z_ref, atol=1e-4, rtol=1e-4), "z mismatch vs reference"
    assert jnp.allclose(mu, mu_ref, atol=1e-4, rtol=1e-4), "mu mismatch vs reference"
    assert jnp.allclose(logvar, lv_ref, atol=1e-4, rtol=1e-4), "logvar mismatch"

    print("KERNEL_OK")
</pallas_src>

<mosaic_0001>
module attributes {stable_mosaic.version = 11 : i64} {
  func.func @encoder_kernel(%arg0: memref<8x256xf32, #tpu.memory_space<vmem>>, %arg1: memref<256x512xbf16, #tpu.memory_space<vmem>>, %arg2: memref<512x512xbf16, #tpu.memory_space<vmem>>, %arg3: memref<512x64xbf16, #tpu.memory_space<vmem>>, %arg4: memref<8x512xf32, #tpu.memory_space<vmem>>, %arg5: memref<8x32xf32, #tpu.memory_space<vmem>>, %arg6: memref<8x128xf32, #tpu.memory_space<vmem>>) attributes {dimension_semantics = [], scalar_prefetch = 0 : i64, scratch_operands = 0 : i64, tpu.core_type = #tpu.core_type<tc>} {
    %c0 = arith.constant 0 : index
    %c0_0 = arith.constant 0 : index
    %0 = vector.load %arg0[%c0, %c0_0] : memref<8x256xf32, #tpu.memory_space<vmem>>, vector<8x256xf32>
    %c0_1 = arith.constant 0 : index
    %c0_2 = arith.constant 0 : index
    %1 = vector.load %arg4[%c0_1, %c0_2] : memref<8x512xf32, #tpu.memory_space<vmem>>, vector<1x512xf32>
    %c1 = arith.constant 1 : index
    %c0_3 = arith.constant 0 : index
    %2 = vector.load %arg4[%c1, %c0_3] : memref<8x512xf32, #tpu.memory_space<vmem>>, vector<1x512xf32>
    %c2 = arith.constant 2 : index
    %c0_4 = arith.constant 0 : index
    %3 = vector.load %arg4[%c2, %c0_4] : memref<8x512xf32, #tpu.memory_space<vmem>>, vector<1x512xf32>
    %c3 = arith.constant 3 : index
    %c0_5 = arith.constant 0 : index
    %4 = vector.load %arg4[%c3, %c0_5] : memref<8x512xf32, #tpu.memory_space<vmem>>, vector<1x512xf32>
    %c4 = arith.constant 4 : index
    %c0_6 = arith.constant 0 : index
    %5 = vector.load %arg4[%c4, %c0_6] : memref<8x512xf32, #tpu.memory_space<vmem>>, vector<1x64xf32>
    %c0_7 = arith.constant 0 : index
    %c0_8 = arith.constant 0 : index
    %6 = vector.load %arg1[%c0_7, %c0_8] : memref<256x512xbf16, #tpu.memory_space<vmem>>, vector<256x512xbf16>
    %cst = arith.constant dense<0.000000e+00> : vector<8x512xf32>
    %7 = tpu.matmul %0, %6, %cst {dimension_numbers = #tpu.dot_dimension_numbers<[1], [0], [0], [1], [0, 0, 1, 1], [], []>} : vector<8x256xf32>, vector<256x512xbf16>, vector<8x512xf32> -> vector<8x512xf32>
    %8 = vector.broadcast %1 : vector<1x512xf32> to vector<8x512xf32>
    %9 = arith.addf %7, %8 : vector<8x512xf32>
    %cst_9 = arith.constant 0.000000e+00 : f32
    %10 = vector.broadcast %cst_9 : f32 to vector<8x512xf32>
    %11 = arith.cmpf ogt, %9, %10 : vector<8x512xf32>
    %cst_10 = arith.constant 2.000000e-01 : f32
    %12 = vector.broadcast %cst_10 : f32 to vector<8x512xf32>
    %13 = arith.mulf %12, %9 : vector<8x512xf32>
    %14 = arith.select %11, %9, %13 : vector<8x512xi1>, vector<8x512xf32>
    %c0_11 = arith.constant 0 : index
    %c0_12 = arith.constant 0 : index
    %15 = vector.load %arg2[%c0_11, %c0_12] : memref<512x512xbf16, #tpu.memory_space<vmem>>, vector<512x512xbf16>
    %cst_13 = arith.constant dense<0.000000e+00> : vector<8x512xf32>
    %16 = tpu.matmul %14, %15, %cst_13 {dimension_numbers = #tpu.dot_dimension_numbers<[1], [0], [0], [1], [0, 0, 1, 1], [], []>} : vector<8x512xf32>, vector<512x512xbf16>, vector<8x512xf32> -> vector<8x512xf32>
    %17 = vector.broadcast %2 : vector<1x512xf32> to vector<8x512xf32>
    %18 = arith.addf %16, %17 : vector<8x512xf32>
    %cst_14 = arith.constant dense<0.000000e+00> : vector<512xf32>
    %19 = vector.multi_reduction <add>, %18, %cst_14 [0] : vector<8x512xf32> to vector<512xf32>
    %20 = vector.shape_cast %19 : vector<512xf32> to vector<1x512xf32>
    %cst_15 = arith.constant 8.000000e+00 : f32
    %21 = vector.broadcast %cst_15 : f32 to vector<1x512xf32>
    %22 = arith.divf %20, %21 : vector<1x512xf32>
    %23 = vector.broadcast %22 : vector<1x512xf32> to vector<8x512xf32>
    %24 = arith.subf %18, %23 : vector<8x512xf32>
    %25 = arith.mulf %24, %24 : vector<8x512xf32>
    %cst_16 = arith.constant dense<0.000000e+00> : vector<512xf32>
    %26 = vector.multi_reduction <add>, %25, %cst_16 [0] : vector<8x512xf32> to vector<512xf32>
    %27 = vector.shape_cast %26 : vector<512xf32> to vector<1x512xf32>
    %cst_17 = arith.constant 8.000000e+00 : f32
    %28 = vector.broadcast %cst_17 : f32 to vector<1x512xf32>
    %29 = arith.divf %27, %28 : vector<1x512xf32>
    %cst_18 = arith.constant 9.99999974E-6 : f32
    %30 = vector.broadcast %cst_18 : f32 to vector<1x512xf32>
    %31 = arith.addf %29, %30 : vector<1x512xf32>
    %32 = math.rsqrt %31 : vector<1x512xf32>
    %33 = vector.broadcast %32 : vector<1x512xf32> to vector<8x512xf32>
    %34 = arith.mulf %24, %33 : vector<8x512xf32>
    %35 = vector.broadcast %3 : vector<1x512xf32> to vector<8x512xf32>
    %36 = arith.mulf %34, %35 : vector<8x512xf32>
    %37 = vector.broadcast %4 : vector<1x512xf32> to vector<8x512xf32>
    %38 = arith.addf %36, %37 : vector<8x512xf32>
    %cst_19 = arith.constant 0.000000e+00 : f32
    %39 = vector.broadcast %cst_19 : f32 to vector<8x512xf32>
    %40 = arith.cmpf ogt, %38, %39 : vector<8x512xf32>
    %cst_20 = arith.constant 2.000000e-01 : f32
    %41 = vector.broadcast %cst_20 : f32 to vector<8x512xf32>
    %42 = arith.mulf %41, %38 : vector<8x512xf32>
    %43 = arith.select %40, %38, %42 : vector<8x512xi1>, vector<8x512xf32>
    %c0_21 = arith.constant 0 : index
    %c0_22 = arith.constant 0 : index
    %44 = vector.load %arg3[%c0_21, %c0_22] : memref<512x64xbf16, #tpu.memory_space<vmem>>, vector<512x64xbf16>
    %cst_23 = arith.constant dense<0.000000e+00> : vector<8x64xf32>
    %45 = tpu.matmul %43, %44, %cst_23 {dimension_numbers = #tpu.dot_dimension_numbers<[1], [0], [0], [1], [0, 0, 1, 1], [], []>} : vector<8x512xf32>, vector<512x64xbf16>, vector<8x64xf32> -> vector<8x64xf32>
    %46 = vector.broadcast %5 : vector<1x64xf32> to vector<8x64xf32>
    %47 = arith.addf %45, %46 : vector<8x64xf32>
    %48 = vector.extract_strided_slice %47 {offsets = [0, 0], sizes = [8, 32], strides = [1, 1]} : vector<8x64xf32> to vector<8x32xf32>
    %49 = vector.extract_strided_slice %47 {offsets = [0, 32], sizes = [8, 32], strides = [1, 1]} : vector<8x64xf32> to vector<8x32xf32>
    %cst_24 = arith.constant 5.000000e-01 : f32
    %50 = vector.broadcast %cst_24 : f32 to vector<8x32xf32>
    %51 = arith.mulf %49, %50 : vector<8x32xf32>
    %52 = math.exp %51 : vector<8x32xf32>
    %c0_25 = arith.constant 0 : index
    %c0_26 = arith.constant 0 : index
    %53 = vector.load %arg5[%c0_25, %c0_26] : memref<8x32xf32, #tpu.memory_space<vmem>>, vector<8x32xf32>
    %54 = arith.mulf %53, %52 : vector<8x32xf32>
    %55 = arith.addf %54, %48 : vector<8x32xf32>
    %cst_27 = arith.constant 0.000000e+00 : f32
    %56 = vector.broadcast %cst_27 : f32 to vector<8x32xf32>
    %57 = tpu.concatenate %55, %47, %56 in 1 : vector<8x32xf32>, vector<8x64xf32>, vector<8x32xf32> -> vector<8x128xf32>
    %c0_28 = arith.constant 0 : index
    %c0_29 = arith.constant 0 : index
    %58 = vector.load %arg6[%c0_28, %c0_29] : memref<8x128xf32, #tpu.memory_space<vmem>>, vector<8x128xf32>
    tpu.vector_store %arg6[%c0_28, %c0_29], %57 {strides = array<i32>} : memref<8x128xf32, #tpu.memory_space<vmem>>, vector<8x128xf32>,
    return
  }
}

</mosaic_0001>

<bundles_post_ra>
// kernel: encoder_forward.1
= control target key start
LH: loop header
LB: loop body
LE: loop exit
PB: predicated region body
PF: predicated region fallthrough
CT: control target
= control target key end

     0   :  { %11 = vsyncpa [#allocation3], 0  ;;  %s3471_s0 = inlined_call_operand.vmem [shape: f32[8,256], index: 0, kind: input, shape index: {}]   ;;  %s3472_s1 = inlined_call_operand.hbm [shape: bf16[256,512], index: 1, kind: input, shape index: {}]   ;;  %s3473_s2 = inlined_call_operand.hbm [shape: bf16[512,512], index: 2, kind: input, shape index: {}]   ;;  %s3474_s3 = inlined_call_operand.vmem [shape: bf16[512,64], index: 3, kind: input, shape index: {}]   ;;  %s3475_s4 = inlined_call_operand.vmem [shape: f32[8,512], index: 4, kind: input, shape index: {}]   ;;  %s3476_s5 = inlined_call_operand.vmem [shape: f32[8,32], index: 5, kind: input, shape index: {}]   ;;  %s3477_s6 = inlined_call_operand.vmem [shape: f32[8,128], index: 6, kind: output, shape index: {}]  }
   0x1   :  { %s19_s23 = sshll.u32 %s3472_s1, 4  ;;  %s20_s23 = int_to_ptr.hbm [resolvable:$true] %s19_s23 }
   0x2   :  { %12 = vsyncpa [#allocation5], 0  ;;  %s3215_s24 = smov [#allocation2]   ;;  %s32_s28 = sshll.u32 %s3473_s2, 4  ;;  %s33_s28 = int_to_ptr.hbm [resolvable:$true] %s32_s28 }
   0x3   :  { %s21_s25 = sshll.u32 %s3215_s24, 4  ;;  %s3216_s29 = smov 256   ;;  %s22_s25 = int_to_ptr.vmem [resolvable:$true] %s21_s25 }
   0x4   :  { %s3217_s30 = smov 16   ;;  %s3218_s7 = smov [#allocation4]  }
   0x5   :  { %27 = dma.hbm_to_vmem [thread:$0]  %s20_s23, 8192, %s22_s25, [#allocation3], %s3216_s29, %s3216_s29, %s3217_s30  }
   0x6   :  { %s34_s8 = sshll.u32 %s3218_s7, 4  ;;  %s35_s8 = int_to_ptr.vmem [resolvable:$true] %s34_s8 }
   0x7   :  { %40 = dma.hbm_to_vmem [thread:$0]  %s33_s28, 16384, %s35_s8, [#allocation5], %s3216_s29, %s3216_s29, %s3217_s30  }
   0x8   :  { %3211 = dma.done.wait [#allocation3], 8192  }
   0x9   :  { %3212 = vsyncadd [#allocation3], 4294959104 }
   0xa   :  { %3213 = dma.done.wait [#allocation5], 16384  }
   0xb   :  { %3214 = vsyncadd [#allocation5], 4294950912  ;;  %v2138_v0 = vld [vmem:[#allocation2 + $0xe0] sm:$0xf]  ;;  %v2950_v1 = vld [vmem:[#allocation2 + $0xec] sm:$0xf0] }
   0xc   :  { %v2948_v2 = vld [vmem:[#allocation2 + $0xe4] sm:$0xf]  ;;  %v2139_v3 = vor.u32 %v2950_v1, %v2138_v0  ;;  %v2140_v4 = vld [vmem:[#allocation2 + $0xf0] sm:$0xf0]  ;;  %v2266_v5 = vld [vmem:[#allocation2 + $0x1e0] sm:$0xf] }
   0xd   :  { %v2982_v6 = vld [vmem:[#allocation2 + $0x1ec] sm:$0xf0]  ;;  %v2143_v7 = vor.u32 %v2948_v2, %v2140_v4  ;;  %v2980_v9 = vld [vmem:[#allocation2 + $0x1e4] sm:$0xf]  ;;  %v2268_v10 = vld [vmem:[#allocation2 + $0x1f0] sm:$0xf0] }
   0xe   :  { %v2267_v8 = vor.u32 %v2982_v6, %v2266_v5  ;;  %v2122_v11 = vld [vmem:[#allocation2 + $0xc0] sm:$0xf]  ;;  %458 = vmatpush.bf16.msra.mxu0 %v2139_v3  ;;  %v2271_v12 = vor.u32 %v2980_v9, %v2268_v10  ;;  %v2946_v13 = vld [vmem:[#allocation2 + $0xcc] sm:$0xf0]  ;;  %v2944_v14 = vld [vmem:[#allocation2 + $0xc4] sm:$0xf] }
   0xf   :  { %v2124_v15 = vld [vmem:[#allocation2 + $0xd0] sm:$0xf0]  ;;  %482 = vmatpush.bf16.msra.mxu2 %v2143_v7  ;;  %v2123_v16 = vor.u32 %v2946_v13, %v2122_v11  ;;  %v2250_v18 = vld [vmem:[#allocation2 + $0x1c0] sm:$0xf]  ;;  %v2978_v19 = vld [vmem:[#allocation2 + $0x1cc] sm:$0xf0] }
  0x10   :  { %470 = vmatpush.bf16.msra.mxu1 %v2267_v8  ;;  %v2127_v17 = vor.u32 %v2944_v14, %v2124_v15  ;;  %v2976_v20 = vld [vmem:[#allocation2 + $0x1c4] sm:$0xf]  ;;  %494 = vmatpush.bf16.msra.mxu3 %v2271_v12  ;;  %v2251_v21 = vor.u32 %v2978_v19, %v2250_v18  ;;  %v2252_v22 = vld [vmem:[#allocation2 + $0x1d0] sm:$0xf0]  ;;  %v2106_v23 = vld [vmem:[#allocation2 + $0xa0] sm:$0xf] }
  0x11   :  { %v2942_v24 = vld [vmem:[#allocation2 + $0xac] sm:$0xf0]  ;;  %v2255_v25 = vor.u32 %v2976_v20, %v2252_v22  ;;  %v2940_v26 = vld [vmem:[#allocation2 + $0xa4] sm:$0xf]  ;;  %v2108_v27 = vld [vmem:[#allocation2 + $0xb0] sm:$0xf0] }
  0x12   :  { %v2234_v28 = vld [vmem:[#allocation2 + $0x1a0] sm:$0xf]  ;;  %459 = vmatpush.bf16.msra.mxu0 %v2123_v16  ;;  %v2107_v29 = vor.u32 %v2942_v24, %v2106_v23  ;;  %v2974_v30 = vld [vmem:[#allocation2 + $0x1ac] sm:$0xf0]  ;;  %v2972_v31 = vld [vmem:[#allocation2 + $0x1a4] sm:$0xf]  ;;  %v2111_v33 = vor.u32 %v2940_v26, %v2108_v27 }
  0x13   :  { %v2236_v32 = vld [vmem:[#allocation2 + $0x1b0] sm:$0xf0]  ;;  %483 = vmatpush.bf16.msra.mxu2 %v2127_v17  ;;  %v2235_v34 = vor.u32 %v2974_v30, %v2234_v28  ;;  %v2090_v35 = vld [vmem:[#allocation2 + $0x80] sm:$0xf]  ;;  %v2938_v36 = vld [vmem:[#allocation2 + $0x8c] sm:$0xf0] }
  0x14   :  { %471 = vmatpush.bf16.msra.mxu1 %v2251_v21  ;;  %v2936_v37 = vld [vmem:[#allocation2 + $0x84] sm:$0xf]  ;;  %495 = vmatpush.bf16.msra.mxu3 %v2255_v25  ;;  %v2239_v38 = vor.u32 %v2972_v31, %v2236_v32  ;;  %v2092_v39 = vld [vmem:[#allocation2 + $0x90] sm:$0xf0]  ;;  %v2218_v40 = vld [vmem:[#allocation2 + $0x180] sm:$0xf]  ;;  %v2091_v44 = vor.u32 %v2938_v36, %v2090_v35 }
  0x15   :  { %v2970_v41 = vld [vmem:[#allocation2 + $0x18c] sm:$0xf0]  ;;  %v2968_v42 = vld [vmem:[#allocation2 + $0x184] sm:$0xf]  ;;  %v2220_v43 = vld [vmem:[#allocation2 + $0x190] sm:$0xf0]  ;;  %v2095_v45 = vor.u32 %v2936_v37, %v2092_v39 }
  0x16   :  { %460 = vmatpush.bf16.msra.mxu0 %v2107_v29  ;;  %v2219_v46 = vor.u32 %v2970_v41, %v2218_v40  ;;  %v2074_v47 = vld [vmem:[#allocation2 + $0x60] sm:$0xf]  ;;  %v2934_v48 = vld [vmem:[#allocation2 + $0x6c] sm:$0xf0]  ;;  %v2932_v49 = vld [vmem:[#allocation2 + $0x64] sm:$0xf]  ;;  %v2223_v50 = vor.u32 %v2968_v42, %v2220_v43 }
  0x17   :  { %484 = vmatpush.bf16.msra.mxu2 %v2111_v33  ;;  %v2076_v51 = vld [vmem:[#allocation2 + $0x70] sm:$0xf0]  ;;  %v2202_v52 = vld [vmem:[#allocation2 + $0x160] sm:$0xf]  ;;  %v2966_v53 = vld [vmem:[#allocation2 + $0x16c] sm:$0xf0]  ;;  %v2075_v56 = vor.u32 %v2934_v48, %v2074_v47 }
  0x18   :  { %472 = vmatpush.bf16.msra.mxu1 %v2235_v34  ;;  %496 = vmatpush.bf16.msra.mxu3 %v2239_v38  ;;  %v2964_v54 = vld [vmem:[#allocation2 + $0x164] sm:$0xf]  ;;  %v2204_v55 = vld [vmem:[#allocation2 + $0x170] sm:$0xf0]  ;;  %v2079_v57 = vor.u32 %v2932_v49, %v2076_v51  ;;  %v2203_v58 = vor.u32 %v2966_v53, %v2202_v52  ;;  %v2058_v59 = vld [vmem:[#allocation2 + $0x40] sm:$0xf] }
  0x19   :  { %v2930_v60 = vld [vmem:[#allocation2 + $0x4c] sm:$0xf0]  ;;  %v2928_v61 = vld [vmem:[#allocation2 + $0x44] sm:$0xf]  ;;  %v2207_v62 = vor.u32 %v2964_v54, %v2204_v55  ;;  %v2060_v63 = vld [vmem:[#allocation2 + $0x50] sm:$0xf0] }
  0x1a   :  { %461 = vmatpush.bf16.msra.mxu0 %v2091_v44  ;;  %v2186_v0 = vld [vmem:[#allocation2 + $0x140] sm:$0xf]  ;;  %v2962_v1 = vld [vmem:[#allocation2 + $0x14c] sm:$0xf0]  ;;  %v2960_v2 = vld [vmem:[#allocation2 + $0x144] sm:$0xf]  ;;  %v2059_v4 = vor.u32 %v2930_v60, %v2058_v59  ;;  %v2063_v5 = vor.u32 %v2928_v61, %v2060_v63 }
  0x1b   :  { %485 = vmatpush.bf16.msra.mxu2 %v2095_v45  ;;  %v2188_v3 = vld [vmem:[#allocation2 + $0x150] sm:$0xf0]  ;;  %v2187_v6 = vor.u32 %v2962_v1, %v2186_v0  ;;  %v2042_v7 = vld [vmem:[#allocation2 + $0x20] sm:$0xf]  ;;  %v2926_v8 = vld [vmem:[#allocation2 + $0x2c] sm:$0xf0] }
  0x1c   :  { %473 = vmatpush.bf16.msra.mxu1 %v2219_v46  ;;  %497 = vmatpush.bf16.msra.mxu3 %v2223_v50  ;;  %v2924_v9 = vld [vmem:[#allocation2 + $0x24] sm:$0xf]  ;;  %v2191_v10 = vor.u32 %v2960_v2, %v2188_v3  ;;  %v2044_v11 = vld [vmem:[#allocation2 + $0x30] sm:$0xf0]  ;;  %v2170_v12 = vld [vmem:[#allocation2 + $0x120] sm:$0xf]  ;;  %v2043_v16 = vor.u32 %v2926_v8, %v2042_v7 }
  0x1d   :  { %v2958_v13 = vld [vmem:[#allocation2 + $0x12c] sm:$0xf0]  ;;  %v2956_v14 = vld [vmem:[#allocation2 + $0x124] sm:$0xf]  ;;  %v2172_v15 = vld [vmem:[#allocation2 + $0x130] sm:$0xf0]  ;;  %v2047_v18 = vor.u32 %v2924_v9, %v2044_v11 }
  0x1e   :  { %462 = vmatpush.bf16.msra.mxu0 %v2075_v56  ;;  %v2026_v17 = vld [vmem:[#allocation2] sm:$0xf]  ;;  %v2171_v19 = vor.u32 %v2958_v13, %v2170_v12  ;;  %v2922_v20 = vld [vmem:[#allocation2 + $0xc] sm:$0xf0]  ;;  %v2920_v21 = vld [vmem:[#allocation2 + $0x4] sm:$0xf]  ;;  %v2175_v23 = vor.u32 %v2956_v14, %v2172_v15 }
  0x1f   :  { %486 = vmatpush.bf16.msra.mxu2 %v2079_v57  ;;  %v2028_v22 = vld [vmem:[#allocation2 + $0x10] sm:$0xf0]  ;;  %v2146_v24 = vld [vmem:[#allocation2 + $0xe8] sm:$0xf]  ;;  %v2951_v25 = vld [vmem:[#allocation2 + $0xf4] sm:$0xf0]  ;;  %v2027_v30 = vor.u32 %v2922_v20, %v2026_v17 }
  0x20   :  { %474 = vmatpush.bf16.msra.mxu1 %v2203_v58  ;;  %498 = vmatpush.bf16.msra.mxu3 %v2207_v62  ;;  %v2949_v26 = vld [vmem:[#allocation2 + $0xec] sm:$0xf]  ;;  %v2148_v27 = vld [vmem:[#allocation2 + $0xf8] sm:$0xf0]  ;;  %v2154_v28 = vld [vmem:[#allocation2 + $0x100] sm:$0xf]  ;;  %v2031_v33 = vor.u32 %v2920_v21, %v2028_v22  ;;  %v2147_v34 = vor.u32 %v2951_v25, %v2146_v24 }
  0x21   :  { %v2954_v29 = vld [vmem:[#allocation2 + $0x10c] sm:$0xf0]  ;;  %v2952_v31 = vld [vmem:[#allocation2 + $0x104] sm:$0xf]  ;;  %v2156_v32 = vld [vmem:[#allocation2 + $0x110] sm:$0xf0]  ;;  %v2151_v37 = vor.u32 %v2949_v26, %v2148_v27 }
  0x22   :  { %463 = vmatpush.bf16.msra.mxu0 %v2059_v4  ;;  %v2274_v35 = vld [vmem:[#allocation2 + $0x1e8] sm:$0xf]  ;;  %v2983_v36 = vld [vmem:[#allocation2 + $0x1f4] sm:$0xf0]  ;;  %v2155_v38 = vor.u32 %v2954_v29, %v2154_v28  ;;  %v2981_v39 = vld [vmem:[#allocation2 + $0x1ec] sm:$0xf]  ;;  %v2159_v41 = vor.u32 %v2952_v31, %v2156_v32 }
  0x23   :  { %487 = vmatpush.bf16.msra.mxu2 %v2063_v5  ;;  %v2276_v40 = vld [vmem:[#allocation2 + $0x1f8] sm:$0xf0]  ;;  %v2130_v42 = vld [vmem:[#allocation2 + $0xc8] sm:$0xf]  ;;  %v2947_v43 = vld [vmem:[#allocation2 + $0xd4] sm:$0xf0]  ;;  %v2275_v45 = vor.u32 %v2983_v36, %v2274_v35 }
  0x24   :  { %475 = vmatpush.bf16.msra.mxu1 %v2187_v6  ;;  %499 = vmatpush.bf16.msra.mxu3 %v2191_v10  ;;  %v3266_v44 = vld [vmem:[%s3471_s0] sm:$0xff]  ;;  %v2945_v46 = vld [vmem:[#allocation2 + $0xcc] sm:$0xf]  ;;  %v2132_v47 = vld [vmem:[#allocation2 + $0xd8] sm:$0xf0]  ;;  %v2279_v48 = vor.u32 %v2981_v39, %v2276_v40  ;;  %v2131_v52 = vor.u32 %v2947_v43, %v2130_v42  ;;  %s3220_s29 = smov 96  }
  0x25   :  { %v2258_v49 = vld [vmem:[#allocation2 + $0x1c8] sm:$0xf]  ;;  %v2979_v50 = vld [vmem:[#allocation2 + $0x1d4] sm:$0xf0]  ;;  %v2977_v53 = vld [vmem:[#allocation2 + $0x1cc] sm:$0xf]  ;;  %v2135_v55 = vor.u32 %v2945_v46, %v2132_v47 }
  0x26   :  { %464 = vmatpush.bf16.msra.mxu0 %v2043_v16  ;;  %v3271_v51 = vld [vmem:[%s3471_s0 + $0x8] sm:$0xff]  ;;  %v2260_v54 = vld [vmem:[#allocation2 + $0x1d8] sm:$0xf0]  ;;  %v2943_v57 = vld [vmem:[#allocation2 + $0xb4] sm:$0xf0]  ;;  %v2259_v58 = vor.u32 %v2979_v50, %v2258_v49  ;;  %s3221_s30 = smov 32  }
  0x27   :  { %488 = vmatpush.bf16.msra.mxu2 %v2047_v18  ;;  %v2114_v56 = vld [vmem:[#allocation2 + $0xa8] sm:$0xf]  ;;  %v2941_v59 = vld [vmem:[#allocation2 + $0xac] sm:$0xf]  ;;  %v2116_v60 = vld [vmem:[#allocation2 + $0xb8] sm:$0xf0]  ;;  %v2263_v61 = vor.u32 %v2977_v53, %v2260_v54 }
  0x28   :  { %476 = vmatpush.bf16.msra.mxu1 %v2171_v19  ;;  %500 = vmatpush.bf16.msra.mxu3 %v2175_v23  ;;  %v2242_v62 = vld [vmem:[#allocation2 + $0x1a8] sm:$0xf]  ;;  %v2975_v63 = vld [vmem:[#allocation2 + $0x1b4] sm:$0xf0]  ;;  %v2115_v0 = vor.u32 %v2943_v57, %v2114_v56  ;;  %v2973_v1 = vld [vmem:[#allocation2 + $0x1ac] sm:$0xf]  ;;  %v2119_v3 = vor.u32 %v2941_v59, %v2116_v60 }
  0x29   :  { %v2244_v2 = vld [vmem:[#allocation2 + $0x1b8] sm:$0xf0]  ;;  %v2098_v4 = vld [vmem:[#allocation2 + $0x88] sm:$0xf]  ;;  %v2939_v5 = vld [vmem:[#allocation2 + $0x94] sm:$0xf0]  ;;  %v2243_v6 = vor.u32 %v2975_v63, %v2242_v62 }
  0x2a   :  { %465 = vmatpush.bf16.msra.mxu0 %v2027_v30  ;;  %v2937_v7 = vld [vmem:[#allocation2 + $0x8c] sm:$0xf]  ;;  %v2100_v8 = vld [vmem:[#allocation2 + $0x98] sm:$0xf0]  ;;  %v2247_v9 = vor.u32 %v2973_v1, %v2244_v2  ;;  %v2226_v10 = vld [vmem:[#allocation2 + $0x188] sm:$0xf]  ;;  %v2099_v12 = vor.u32 %v2939_v5, %v2098_v4 }
  0x2b   :  { %489 = vmatpush.bf16.msra.mxu2 %v2031_v33  ;;  %v2971_v11 = vld [vmem:[#allocation2 + $0x194] sm:$0xf0]  ;;  %v2969_v13 = vld [vmem:[#allocation2 + $0x18c] sm:$0xf]  ;;  %v2228_v14 = vld [vmem:[#allocation2 + $0x198] sm:$0xf0]  ;;  %v2103_v15 = vor.u32 %v2937_v7, %v2100_v8 }
  0x2c   :  { %477 = vmatpush.bf16.msra.mxu1 %v2155_v38  ;;  %501 = vmatpush.bf16.msra.mxu3 %v2159_v41  ;;  %v2082_v16 = vld [vmem:[#allocation2 + $0x68] sm:$0xf]  ;;  %v2935_v17 = vld [vmem:[#allocation2 + $0x74] sm:$0xf0]  ;;  %v2227_v18 = vor.u32 %v2971_v11, %v2226_v10  ;;  %v2933_v19 = vld [vmem:[#allocation2 + $0x6c] sm:$0xf]  ;;  %v2231_v21 = vor.u32 %v2969_v13, %v2228_v14 }
  0x2d   :  { %466 = vmatmul.f32.vlgmr.msra.gmra.mxu0 %v3266_v44  ;;  %v2084_v20 = vld [vmem:[#allocation2 + $0x78] sm:$0xf0]  ;;  %v2210_v22 = vld [vmem:[#allocation2 + $0x168] sm:$0xf]  ;;  %v2967_v23 = vld [vmem:[#allocation2 + $0x174] sm:$0xf0]  ;;  %v2083_v24 = vor.u32 %v2935_v17, %v2082_v16 }
  0x2e   :  { %506 = vmatpush.bf16.msrb.mxu0 %v2147_v34  ;;  %490 = vmatmul.f32.vlgmr.msra.gmra.mxu2 %v3266_v44  ;;  %v2965_v25 = vld [vmem:[#allocation2 + $0x16c] sm:$0xf]  ;;  %v2212_v26 = vld [vmem:[#allocation2 + $0x178] sm:$0xf0]  ;;  %v2087_v27 = vor.u32 %v2933_v19, %v2084_v20  ;;  %v2066_v28 = vld [vmem:[#allocation2 + $0x48] sm:$0xf]  ;;  %v2211_v30 = vor.u32 %v2967_v23, %v2210_v22 }
  0x2f   :  { %530 = vmatpush.bf16.msrb.mxu2 %v2151_v37  ;;  %478 = vmatmul.f32.vlgmr.msra.gmra.mxu1 %v3271_v51  ;;  %v2931_v29 = vld [vmem:[#allocation2 + $0x54] sm:$0xf0]  ;;  %v2929_v31 = vld [vmem:[#allocation2 + $0x4c] sm:$0xf]  ;;  %v2068_v32 = vld [vmem:[#allocation2 + $0x58] sm:$0xf0]  ;;  %v2215_v33 = vor.u32 %v2965_v25, %v2212_v26 }
  0x30   :  { %518 = vmatpush.bf16.msrb.mxu1 %v2275_v45  ;;  %542 = vmatpush.bf16.msrb.mxu3 %v2279_v48  ;;  %v2194_v34 = vld [vmem:[#allocation2 + $0x148] sm:$0xf]  ;;  %v2963_v35 = vld [vmem:[#allocation2 + $0x154] sm:$0xf0]  ;;  %v2067_v36 = vor.u32 %v2931_v29, %v2066_v28  ;;  %v2961_v37 = vld [vmem:[#allocation2 + $0x14c] sm:$0xf]  ;;  %v2071_v39 = vor.u32 %v2929_v31, %v2068_v32 }
  0x31   :  { %502 = vmatmul.f32.vlgmr.msra.gmra.mxu3 %v3271_v51  ;;  %v2196_v38 = vld [vmem:[#allocation2 + $0x158] sm:$0xf0]  ;;  %v2050_v40 = vld [vmem:[#allocation2 + $0x28] sm:$0xf]  ;;  %v2927_v41 = vld [vmem:[#allocation2 + $0x34] sm:$0xf0]  ;;  %v2195_v42 = vor.u32 %v2963_v35, %v2194_v34 }
  0x32   :  { %507 = vmatpush.bf16.msrb.mxu0 %v2131_v52  ;;  %v2925_v43 = vld [vmem:[#allocation2 + $0x2c] sm:$0xf]  ;;  %v2052_v45 = vld [vmem:[#allocation2 + $0x38] sm:$0xf0]  ;;  %v2199_v46 = vor.u32 %v2961_v37, %v2196_v38  ;;  %v2178_v47 = vld [vmem:[#allocation2 + $0x128] sm:$0xf]  ;;  %v2051_v49 = vor.u32 %v2927_v41, %v2050_v40 }
  0x33   :  { %531 = vmatpush.bf16.msrb.mxu2 %v2135_v55  ;;  %v2959_v48 = vld [vmem:[#allocation2 + $0x134] sm:$0xf0]  ;;  %v2957_v50 = vld [vmem:[#allocation2 + $0x12c] sm:$0xf]  ;;  %v2180_v52 = vld [vmem:[#allocation2 + $0x138] sm:$0xf0]  ;;  %v2055_v53 = vor.u32 %v2925_v43, %v2052_v45 }
  0x34   :  { %519 = vmatpush.bf16.msrb.mxu1 %v2259_v58  ;;  %543 = vmatpush.bf16.msrb.mxu3 %v2263_v61  ;;  %v2034_v54 = vld [vmem:[#allocation2 + $0x8] sm:$0xf]  ;;  %v2923_v55 = vld [vmem:[#allocation2 + $0x14] sm:$0xf0]  ;;  %v2921_v56 = vld [vmem:[#allocation2 + $0xc] sm:$0xf]  ;;  %v2179_v57 = vor.u32 %v2959_v48, %v2178_v47  ;;  %v2183_v61 = vor.u32 %v2957_v50, %v2180_v52 }
  0x35   :  { %v2036_v58 = vld [vmem:[#allocation2 + $0x18] sm:$0xf0]  ;;  %v2394_v59 = vld [vmem:[#allocation4 + $0xe0] sm:$0xf]  ;;  %v3014_v60 = vld [vmem:[#allocation4 + $0xec] sm:$0xf0] }
  0x36   :  { %508 = vmatpush.bf16.msrb.mxu0 %v2115_v0  ;;  %v2162_v62 = vld [vmem:[#allocation2 + $0x108] sm:$0xf]  ;;  %v2955_v63 = vld [vmem:[#allocation2 + $0x114] sm:$0xf0]  ;;  %v2035_v0 = vor.u32 %v2923_v55, %v2034_v54  ;;  %v2953_v1 = vld [vmem:[#allocation2 + $0x10c] sm:$0xf]  ;;  %v2039_v4 = vor.u32 %v2921_v56, %v2036_v58  ;;  %v2395_v5 = vor.u32 %v3014_v60, %v2394_v59 }
  0x37   :  { %532 = vmatpush.bf16.msrb.mxu2 %v2119_v3  ;;  %v2164_v2 = vld [vmem:[#allocation2 + $0x118] sm:$0xf0]  ;;  %v2522_v3 = vld [vmem:[#allocation4 + $0x1e0] sm:$0xf]  ;;  %v3078_v8 = vld [vmem:[#allocation4 + $0x2ec] sm:$0xf0] }
  0x38   :  { %520 = vmatpush.bf16.msrb.mxu1 %v2243_v6  ;;  %544 = vmatpush.bf16.msrb.mxu3 %v2247_v9  ;;  %v3046_v6 = vld [vmem:[#allocation4 + $0x1ec] sm:$0xf0]  ;;  %v2650_v7 = vld [vmem:[#allocation4 + $0x2e0] sm:$0xf]  ;;  %v2163_v9 = vor.u32 %v2955_v63, %v2162_v62  ;;  %v2167_v13 = vor.u32 %v2953_v1, %v2164_v2 }
  0x39   :  { %v2378_v10 = vld [vmem:[#allocation4 + $0xc0] sm:$0xf]  ;;  %v3010_v11 = vld [vmem:[#allocation4 + $0xcc] sm:$0xf0]  ;;  %v2523_v16 = vor.u32 %v3046_v6, %v2522_v3 }
  0x3a   :  { %509 = vmatpush.bf16.msrb.mxu0 %v2099_v12  ;;  %v2651_v12 = vor.u32 %v3078_v8, %v2650_v7  ;;  %v2634_v14 = vld [vmem:[#allocation4 + $0x2c0] sm:$0xf]  ;;  %v2379_v17 = vor.u32 %v3010_v11, %v2378_v10  ;;  %v3042_v19 = vld [vmem:[#allocation4 + $0x1cc] sm:$0xf0] }
  0x3b   :  { %533 = vmatpush.bf16.msrb.mxu2 %v2103_v15  ;;  %v3074_v15 = vld [vmem:[#allocation4 + $0x2cc] sm:$0xf0]  ;;  %v2362_v20 = vld [vmem:[#allocation4 + $0xa0] sm:$0xf] }
  0x3c   :  { %521 = vmatpush.bf16.msrb.mxu1 %v2227_v18  ;;  %545 = vmatpush.bf16.msrb.mxu3 %v2231_v21  ;;  %v2506_v18 = vld [vmem:[#allocation4 + $0x1c0] sm:$0xf]  ;;  %v3006_v21 = vld [vmem:[#allocation4 + $0xac] sm:$0xf0]  ;;  %v2635_v22 = vor.u32 %v3074_v15, %v2634_v14  ;;  %v2396_v14 = vld [vmem:[#allocation4 + $0xf0] sm:$0xf0] }
  0x3d   :  { %v2778_v23 = vld [vmem:[#allocation4 + $0x3e0] sm:$0xf]  ;;  %v2507_v25 = vor.u32 %v3042_v19, %v2506_v18  ;;  %v3070_v28 = vld [vmem:[#allocation4 + $0x2ac] sm:$0xf0]  ;;  %v2363_v29 = vor.u32 %v3006_v21, %v2362_v20  ;;  %v3044_v20 = vld [vmem:[#allocation4 + $0x1e4] sm:$0xf] }
  0x3e   :  { %510 = vmatpush.bf16.msrb.mxu0 %v2083_v24  ;;  %v3110_v24 = vld [vmem:[#allocation4 + $0x3ec] sm:$0xf0]  ;;  %v2490_v31 = vld [vmem:[#allocation4 + $0x1a0] sm:$0xf]  ;;  %v2524_v21 = vld [vmem:[#allocation4 + $0x1f0] sm:$0xf0] }
  0x3f   :  { %534 = vmatpush.bf16.msrb.mxu2 %v2087_v27  ;;  %v2779_v26 = vor.u32 %v3110_v24, %v2778_v23  ;;  %v2618_v27 = vld [vmem:[#allocation4 + $0x2a0] sm:$0xf]  ;;  %v3038_v32 = vld [vmem:[#allocation4 + $0x1ac] sm:$0xf0]  ;;  %v2380_v23 = vld [vmem:[#allocation4 + $0xd0] sm:$0xf0] }
  0x40   :  { %522 = vmatpush.bf16.msrb.mxu1 %v2211_v30  ;;  %546 = vmatpush.bf16.msrb.mxu3 %v2215_v33  ;;  %v2346_v30 = vld [vmem:[#allocation4 + $0x80] sm:$0xf]  ;;  %v3002_v33 = vld [vmem:[#allocation4 + $0x8c] sm:$0xf0]  ;;  %v2619_v34 = vor.u32 %v3070_v28, %v2618_v27  ;;  %v3040_v27 = vld [vmem:[#allocation4 + $0x1c4] sm:$0xf] }
  0x41   :  { %v2762_v35 = vld [vmem:[#allocation4 + $0x3c0] sm:$0xf]  ;;  %v3066_v38 = vld [vmem:[#allocation4 + $0x28c] sm:$0xf0]  ;;  %v2347_v40 = vor.u32 %v3002_v33, %v2346_v30  ;;  %v2508_v28 = vld [vmem:[#allocation4 + $0x1d0] sm:$0xf0] }
  0x42   :  { %511 = vmatpush.bf16.msrb.mxu0 %v2067_v36  ;;  %v3106_v36 = vld [vmem:[#allocation4 + $0x3cc] sm:$0xf0]  ;;  %v2602_v37 = vld [vmem:[#allocation4 + $0x280] sm:$0xf]  ;;  %v2364_v30 = vld [vmem:[#allocation4 + $0xb0] sm:$0xf0] }
  0x43   :  { %535 = vmatpush.bf16.msrb.mxu2 %v2071_v39  ;;  %v2491_v39 = vor.u32 %v3038_v32, %v2490_v31  ;;  %v2330_v41 = vld [vmem:[#allocation4 + $0x60] sm:$0xf]  ;;  %v3034_v43 = vld [vmem:[#allocation4 + $0x18c] sm:$0xf0]  ;;  %v2511_v31 = vor.u32 %v3040_v27, %v2508_v28  ;;  %v3036_v33 = vld [vmem:[#allocation4 + $0x1a4] sm:$0xf] }
  0x44   :  { %523 = vmatpush.bf16.msrb.mxu1 %v2195_v42  ;;  %547 = vmatpush.bf16.msrb.mxu3 %v2199_v46  ;;  %v2474_v42 = vld [vmem:[#allocation4 + $0x180] sm:$0xf]  ;;  %v2998_v45 = vld [vmem:[#allocation4 + $0x6c] sm:$0xf0]  ;;  %v2603_v46 = vor.u32 %v3066_v38, %v2602_v37  ;;  %v3032_v38 = vld [vmem:[#allocation4 + $0x184] sm:$0xf] }
  0x45   :  { %v3102_v47 = vld [vmem:[#allocation4 + $0x3ac] sm:$0xf0]  ;;  %v2475_v52 = vor.u32 %v3034_v43, %v2474_v42  ;;  %v2314_v54 = vld [vmem:[#allocation4 + $0x40] sm:$0xf]  ;;  %v2780_v27 = vld [vmem:[#allocation4 + $0x3f0] sm:$0xf0] }
  0x46   :  { %512 = vmatpush.bf16.msrb.mxu0 %v2051_v49  ;;  %v2586_v49 = vld [vmem:[#allocation4 + $0x260] sm:$0xf]  ;;  %v3062_v50 = vld [vmem:[#allocation4 + $0x26c] sm:$0xf0] }
  0x47   :  { %536 = vmatpush.bf16.msrb.mxu2 %v2055_v53  ;;  %v2331_v53 = vor.u32 %v2998_v45, %v2330_v41  ;;  %v2458_v55 = vld [vmem:[#allocation4 + $0x160] sm:$0xf]  ;;  %v3030_v56 = vld [vmem:[#allocation4 + $0x16c] sm:$0xf0]  ;;  %v2587_v58 = vor.u32 %v3062_v50, %v2586_v49  ;;  %v2332_v41 = vld [vmem:[#allocation4 + $0x70] sm:$0xf0] }
  0x48   :  { %524 = vmatpush.bf16.msrb.mxu1 %v2179_v57  ;;  %548 = vmatpush.bf16.msrb.mxu3 %v2183_v61  ;;  %v2994_v57 = vld [vmem:[#allocation4 + $0x4c] sm:$0xf0]  ;;  %v2730_v59 = vld [vmem:[#allocation4 + $0x380] sm:$0xf]  ;;  %v2992_v45 = vld [vmem:[#allocation4 + $0x44] sm:$0xf] }
  0x49   :  { %v3098_v60 = vld [vmem:[#allocation4 + $0x38c] sm:$0xf0]  ;;  %v2570_v62 = vld [vmem:[#allocation4 + $0x240] sm:$0xf]  ;;  %v2315_v1 = vor.u32 %v2994_v57, %v2314_v54  ;;  %v3028_v49 = vld [vmem:[#allocation4 + $0x164] sm:$0xf] }
  0x4a   :  { %513 = vmatpush.bf16.msrb.mxu0 %v2035_v0  ;;  %v2731_v61 = vor.u32 %v3098_v60, %v2730_v59  ;;  %v3058_v63 = vld [vmem:[#allocation4 + $0x24c] sm:$0xf0]  ;;  %v2459_v0 = vor.u32 %v3030_v56, %v2458_v55  ;;  %v2442_v2 = vld [vmem:[#allocation4 + $0x140] sm:$0xf]  ;;  %v2988_v56 = vld [vmem:[#allocation4 + $0x24] sm:$0xf] }
  0x4b   :  { %537 = vmatpush.bf16.msrb.mxu2 %v2039_v4  ;;  %v3026_v3 = vld [vmem:[#allocation4 + $0x14c] sm:$0xf0]  ;;  %v2298_v4 = vld [vmem:[#allocation4 + $0x20] sm:$0xf]  ;;  %v2571_v6 = vor.u32 %v3058_v63, %v2570_v62  ;;  %v3024_v62 = vld [vmem:[#allocation4 + $0x144] sm:$0xf] }
  0x4c   :  { %525 = vmatpush.bf16.msrb.mxu1 %v2163_v9  ;;  %549 = vmatpush.bf16.msrb.mxu3 %v2167_v13  ;;  %v2443_v7 = vor.u32 %v3026_v3, %v2442_v2  ;;  %v2426_v9 = vld [vmem:[#allocation4 + $0x120] sm:$0xf]  ;;  %v3022_v10 = vld [vmem:[#allocation4 + $0x12c] sm:$0xf0]  ;;  %v3012_v13 = vld [vmem:[#allocation4 + $0xe4] sm:$0xf] }
  0x4d   :  { %514 = vmatmul.f32.vlgmr.msrb.gmra.mxu0 %v3266_v44  ;;  %v2282_v11 = vld [vmem:[#allocation4] sm:$0xf]  ;;  %v2427_v15 = vor.u32 %v3022_v10, %v2426_v9  ;;  %v3018_v18 = vld [vmem:[#allocation4 + $0x10c] sm:$0xf0]  ;;  %v2399_v19 = vor.u32 %v3012_v13, %v2396_v14  ;;  %v3020_v13 = vld [vmem:[#allocation4 + $0x124] sm:$0xf] }
  0x4e   :  { %1343 = vmatpush.bf16.msra.mxu0 %v2395_v5  ;;  %538 = vmatmul.f32.vlgmr.msrb.gmra.mxu2 %v3266_v44  ;;  %v2763_v44 = vor.u32 %v3106_v36, %v2762_v35  ;;  %v2990_v5 = vld [vmem:[#allocation4 + $0x2c] sm:$0xf0]  ;;  %v3000_v35 = vld [vmem:[#allocation4 + $0x84] sm:$0xf]  ;;  %v2348_v36 = vld [vmem:[#allocation4 + $0x90] sm:$0xf0] }
  0x4f   :  { %1367 = vmatpush.bf16.msra.mxu2 %v2651_v12  ;;  %526 = vmatmul.f32.vlgmr.msrb.gmra.mxu1 %v3271_v51  ;;  %v2299_v8 = vor.u32 %v2990_v5, %v2298_v4  ;;  %v2986_v12 = vld [vmem:[#allocation4 + $0xc] sm:$0xf0]  ;;  %v2351_v37 = vor.u32 %v3000_v35, %v2348_v36  ;;  %v2554_v54 = vld [vmem:[#allocation4 + $0x220] sm:$0xf]  ;;  %v2984_v4 = vld [vmem:[#allocation4 + $0x4] sm:$0xf] }
  0x50   :  { %1355 = vmatpush.bf16.msra.mxu1 %v2523_v16  ;;  %550 = vmatmul.f32.vlgmr.msrb.gmra.mxu3 %v3271_v51  ;;  %v2746_v51 = vld [vmem:[#allocation4 + $0x3a0] sm:$0xf]  ;;  %v2283_v16 = vor.u32 %v2986_v12, %v2282_v11  ;;  %v3054_v55 = vld [vmem:[#allocation4 + $0x22c] sm:$0xf0]  ;;  %v2428_v14 = vld [vmem:[#allocation4 + $0x130] sm:$0xf0] }
  0x51   :  { %1379 = vmatpush.bf16.msra.mxu3 %v2779_v26  ;;  %v2747_v48 = vor.u32 %v3102_v47, %v2746_v51  ;;  %v2714_v47 = vld [vmem:[#allocation4 + $0x360] sm:$0xf]  ;;  %v2555_v57 = vor.u32 %v3054_v55, %v2554_v54  ;;  %v3050_v3 = vld [vmem:[#allocation4 + $0x20c] sm:$0xf0]  ;;  %v3064_v35 = vld [vmem:[#allocation4 + $0x284] sm:$0xf] }
  0x52   :  { %1344 = vmatpush.bf16.msra.mxu0 %v2379_v17  ;;  %v2410_v17 = vld [vmem:[#allocation4 + $0x100] sm:$0xf]  ;;  %v3086_v12 = vld [vmem:[#allocation4 + $0x32c] sm:$0xf0]  ;;  %v2604_v36 = vld [vmem:[#allocation4 + $0x290] sm:$0xf0] }
  0x53   :  { %1368 = vmatpush.bf16.msra.mxu2 %v2635_v22  ;;  %v3008_v22 = vld [vmem:[#allocation4 + $0xc4] sm:$0xf]  ;;  %v2411_v24 = vor.u32 %v3018_v18, %v2410_v17  ;;  %v2698_v60 = vld [vmem:[#allocation4 + $0x340] sm:$0xf]  ;;  %v2636_v18 = vld [vmem:[#allocation4 + $0x2d0] sm:$0xf0] }
  0x54   :  { %1356 = vmatpush.bf16.msra.mxu1 %v2507_v25  ;;  %v2527_v25 = vor.u32 %v3044_v20, %v2524_v21  ;;  %v2383_v26 = vor.u32 %v3008_v22, %v2380_v23  ;;  %v2538_v2 = vld [vmem:[#allocation4 + $0x200] sm:$0xf]  ;;  %v3072_v17 = vld [vmem:[#allocation4 + $0x2c4] sm:$0xf]  ;;  %v3082_v21 = vld [vmem:[#allocation4 + $0x30c] sm:$0xf0] }
  0x55   :  { %1380 = vmatpush.bf16.msra.mxu3 %v2763_v44  ;;  %v2539_v5 = vor.u32 %v3050_v3, %v2538_v2  ;;  %v2682_v11 = vld [vmem:[#allocation4 + $0x320] sm:$0xf]  ;;  %v3016_v23 = vld [vmem:[#allocation4 + $0x104] sm:$0xf] }
  0x56   :  { %1345 = vmatpush.bf16.msra.mxu0 %v2363_v29  ;;  %v3004_v29 = vld [vmem:[#allocation4 + $0xa4] sm:$0xf]  ;;  %v2666_v20 = vld [vmem:[#allocation4 + $0x300] sm:$0xf] }
  0x57   :  { %1369 = vmatpush.bf16.msra.mxu2 %v2619_v34  ;;  %v2367_v32 = vor.u32 %v3004_v29, %v2364_v30  ;;  %v2492_v34 = vld [vmem:[#allocation4 + $0x1b0] sm:$0xf0]  ;;  %v2667_v22 = vor.u32 %v3082_v21, %v2666_v20  ;;  %v3068_v29 = vld [vmem:[#allocation4 + $0x2a4] sm:$0xf]  ;;  %v3047_v20 = vld [vmem:[#allocation4 + $0x1f4] sm:$0xf0] }
  0x58   :  { %1357 = vmatpush.bf16.msra.mxu1 %v2491_v39  ;;  %v2495_v44 = vor.u32 %v3036_v33, %v2492_v34  ;;  %v2476_v39 = vld [vmem:[#allocation4 + $0x190] sm:$0xf0]  ;;  %v3052_v55 = vld [vmem:[#allocation4 + $0x224] sm:$0xf] }
  0x59   :  { %1381 = vmatpush.bf16.msra.mxu3 %v2747_v48  ;;  %v2479_v42 = vor.u32 %v3032_v38, %v2476_v39  ;;  %v3094_v48 = vld [vmem:[#allocation4 + $0x36c] sm:$0xf0]  ;;  %v2620_v30 = vld [vmem:[#allocation4 + $0x2b0] sm:$0xf0]  ;;  %v3048_v3 = vld [vmem:[#allocation4 + $0x204] sm:$0xf] }
  0x5a   :  { %1346 = vmatpush.bf16.msra.mxu0 %v2347_v40  ;;  %v2996_v40 = vld [vmem:[#allocation4 + $0x64] sm:$0xf]  ;;  %v2715_v50 = vor.u32 %v3094_v48, %v2714_v47  ;;  %v2764_v33 = vld [vmem:[#allocation4 + $0x3d0] sm:$0xf0] }
  0x5b   :  { %1370 = vmatpush.bf16.msra.mxu2 %v2603_v46  ;;  %v2335_v43 = vor.u32 %v2996_v40, %v2332_v41  ;;  %v2316_v46 = vld [vmem:[#allocation4 + $0x50] sm:$0xf0]  ;;  %v3060_v40 = vld [vmem:[#allocation4 + $0x264] sm:$0xf] }
  0x5c   :  { %1358 = vmatpush.bf16.msra.mxu1 %v2475_v52  ;;  %v2319_v51 = vor.u32 %v2992_v45, %v2316_v46  ;;  %v2460_v52 = vld [vmem:[#allocation4 + $0x170] sm:$0xf0]  ;;  %v3284_v46 = vld [vmem:[%s3475_s4] ss:$8 sm:$0xf] }
  0x5d   :  { %1382 = vmatpush.bf16.msra.mxu3 %v2731_v61  ;;  %v3090_v61 = vld [vmem:[#allocation4 + $0x34c] sm:$0xf0]  ;;  %v2748_v38 = vld [vmem:[#allocation4 + $0x3b0] sm:$0xf0]  ;;  %v3056_v47 = vld [vmem:[#allocation4 + $0x244] sm:$0xf] }
  0x5e   :  { %1347 = vmatpush.bf16.msra.mxu0 %v2331_v53  ;;  %v2463_v53 = vor.u32 %v3028_v49, %v2460_v52  ;;  %v2699_v63 = vor.u32 %v3090_v61, %v2698_v60  ;;  %v2588_v41 = vld [vmem:[#allocation4 + $0x270] sm:$0xf0]  ;;  %v3092_v52 = vld [vmem:[#allocation4 + $0x364] sm:$0xf] }
  0x5f   :  { %1371 = vmatpush.bf16.msra.mxu2 %v2587_v58  ;;  %v2300_v58 = vld [vmem:[#allocation4 + $0x30] sm:$0xf0]  ;;  %v3088_v60 = vld [vmem:[#allocation4 + $0x344] sm:$0xf] }
  0x60   :  { %1359 = vmatpush.bf16.msra.mxu1 %v2459_v0  ;;  %v2303_v59 = vor.u32 %v2988_v56, %v2300_v58  ;;  %v2444_v0 = vld [vmem:[#allocation4 + $0x150] sm:$0xf0]  ;;  %v3080_v21 = vld [vmem:[#allocation4 + $0x304] sm:$0xf] }
  0x61   :  { %1383 = vmatpush.bf16.msra.mxu3 %v2715_v50  ;;  %v2732_v45 = vld [vmem:[#allocation4 + $0x390] sm:$0xf0]  ;;  %v130_v50 = vperm.slane %v3284_v46, 0 }
  0x62   :  { %1348 = vmatpush.bf16.msra.mxu0 %v2315_v1  ;;  %v2447_v1 = vor.u32 %v3024_v62, %v2444_v0  ;;  %v2572_v48 = vld [vmem:[#allocation4 + $0x250] sm:$0xf0]  ;;  %v3015_v0 = vld [vmem:[#allocation4 + $0xf4] sm:$0xf0] }
  0x63   :  { %1372 = vmatpush.bf16.msra.mxu2 %v2571_v6  ;;  %v2284_v6 = vld [vmem:[#allocation4 + $0x10] sm:$0xf0]  ;;  %v2575_v49 = vor.u32 %v3056_v47, %v2572_v48 }
  0x64   :  { %1360 = vmatpush.bf16.msra.mxu1 %v2443_v7  ;;  %v3076_v7 = vld [vmem:[#allocation4 + $0x2e4] sm:$0xf]  ;;  %v2287_v9 = vor.u32 %v2984_v4, %v2284_v6  ;;  %v2556_v56 = vld [vmem:[#allocation4 + $0x230] sm:$0xf0] }
  0x65   :  { %1384 = vmatpush.bf16.msra.mxu3 %v2699_v63  ;;  %v2559_v58 = vor.u32 %v3052_v55, %v2556_v56  ;;  %v2700_v61 = vld [vmem:[#allocation4 + $0x350] sm:$0xf0]  ;;  %v2402_v63 = vld [vmem:[#allocation4 + $0xe8] sm:$0xf] }
  0x66   :  { %1349 = vmatpush.bf16.msra.mxu0 %v2299_v8  ;;  %v2652_v8 = vld [vmem:[#allocation4 + $0x2f0] sm:$0xf0] }
  0x67   :  { %1373 = vmatpush.bf16.msra.mxu2 %v2555_v57  ;;  %v2655_v10 = vor.u32 %v3076_v7, %v2652_v8  ;;  %v2540_v4 = vld [vmem:[#allocation4 + $0x210] sm:$0xf0]  ;;  %v2403_v8 = vor.u32 %v3015_v0, %v2402_v63  ;;  %v3013_v63 = vld [vmem:[#allocation4 + $0xec] sm:$0xf]  ;;  %v2404_v0 = vld [vmem:[#allocation4 + $0xf8] sm:$0xf0] }
  0x68   :  { %1361 = vmatpush.bf16.msra.mxu1 %v2427_v15  ;;  %v2683_v15 = vor.u32 %v3086_v12, %v2682_v11  ;;  %v2543_v6 = vor.u32 %v3048_v3, %v2540_v4  ;;  %v3084_v11 = vld [vmem:[#allocation4 + $0x324] sm:$0xf]  ;;  %v2658_v3 = vld [vmem:[#allocation4 + $0x2e8] sm:$0xf]  ;;  %v3079_v4 = vld [vmem:[#allocation4 + $0x2f4] sm:$0xf0] }
  0x6a   :  { %1350 = vmatpush.bf16.msra.mxu0 %v2283_v16  ;;  %v2431_v16 = vor.u32 %v3020_v13, %v2428_v14  ;;  %1385 = vmatpush.bf16.msra.mxu3 %v2683_v15  ;;  %v2684_v14 = vld [vmem:[#allocation4 + $0x330] sm:$0xf0] }
  0x6b   :  { %1374 = vmatpush.bf16.msra.mxu2 %v2539_v5  ;;  %v131_v5 = vperm.slane %v3284_v46, 1 }
  0x6c   :  { %1362 = vmatpush.bf16.msra.mxu1 %v2411_v24  ;;  %v2412_v24 = vld [vmem:[#allocation4 + $0x110] sm:$0xf0] }
  0x6e   :  { %1391 = vmatpush.bf16.msrb.mxu0 %v2399_v19  ;;  %v2639_v19 = vor.u32 %v3072_v17, %v2636_v18  ;;  %1386 = vmatpush.bf16.msra.mxu3 %v2667_v22  ;;  %v2687_v17 = vor.u32 %v3084_v11, %v2684_v14  ;;  %v2668_v22 = vld [vmem:[#allocation4 + $0x310] sm:$0xf0]  ;;  %v3009_v11 = vld [vmem:[#allocation4 + $0xcc] sm:$0xf]  ;;  %v2659_v14 = vor.u32 %v3079_v4, %v2658_v3  ;;  %v2484_v3 = vld [vmem:[#allocation4 + $0x198] sm:$0xf0] }
  0x6f   :  { %1415 = vmatpush.bf16.msrb.mxu2 %v2655_v10  ;;  %v3011_v10 = vld [vmem:[#allocation4 + $0xd4] sm:$0xf0] }
  0x70   :  { %1403 = vmatpush.bf16.msrb.mxu1 %v2527_v25  ;;  %v3108_v25 = vld [vmem:[#allocation4 + $0x3e4] sm:$0xf] }
  0x71   :  { %v2783_v28 = vor.u32 %v3108_v25, %v2780_v27  ;;  %v3007_v25 = vld [vmem:[#allocation4 + $0xb4] sm:$0xf0] }
  0x72   :  { %1392 = vmatpush.bf16.msrb.mxu0 %v2383_v26  ;;  %v2415_v26 = vor.u32 %v3016_v23, %v2412_v24  ;;  %v2370_v24 = vld [vmem:[#allocation4 + $0xa8] sm:$0xf] }
  0x73   :  { %1416 = vmatpush.bf16.msrb.mxu2 %v2639_v19  ;;  %1427 = vmatpush.bf16.msrb.mxu3 %v2783_v28 }
  0x74   :  { %1404 = vmatpush.bf16.msrb.mxu1 %v2511_v31  ;;  %v2623_v31 = vor.u32 %v3068_v29, %v2620_v30  ;;  %v2371_v29 = vor.u32 %v3007_v25, %v2370_v24  ;;  %v2514_v30 = vld [vmem:[#allocation4 + $0x1c8] sm:$0xf]  ;;  %v3045_v24 = vld [vmem:[#allocation4 + $0x1ec] sm:$0xf]  ;;  %v2532_v25 = vld [vmem:[#allocation4 + $0x1f8] sm:$0xf0] }
  0x76   :  { %1393 = vmatpush.bf16.msrb.mxu0 %v2367_v32  ;;  %v3104_v32 = vld [vmem:[#allocation4 + $0x3c4] sm:$0xf] }
  0x77   :  { %1417 = vmatpush.bf16.msrb.mxu2 %v2623_v31  ;;  %v2767_v34 = vor.u32 %v3104_v32, %v2764_v33  ;;  %v3043_v31 = vld [vmem:[#allocation4 + $0x1d4] sm:$0xf0]  ;;  %v2354_v33 = vld [vmem:[#allocation4 + $0x88] sm:$0xf] }
  0x78   :  { %1405 = vmatpush.bf16.msrb.mxu1 %v2495_v44  ;;  %v2607_v44 = vor.u32 %v3064_v35, %v2604_v36  ;;  %v2515_v35 = vor.u32 %v3043_v31, %v2514_v30 }
  0x79   :  { %1428 = vmatpush.bf16.msrb.mxu3 %v2767_v34  ;;  %v3003_v34 = vld [vmem:[#allocation4 + $0x94] sm:$0xf0] }
  0x7a   :  { %1394 = vmatpush.bf16.msrb.mxu0 %v2351_v37  ;;  %v3100_v37 = vld [vmem:[#allocation4 + $0x3a4] sm:$0xf]  ;;  %v2355_v36 = vor.u32 %v3003_v34, %v2354_v33  ;;  %v2626_v33 = vld [vmem:[#allocation4 + $0x2a8] sm:$0xf]  ;;  %v3071_v34 = vld [vmem:[#allocation4 + $0x2b4] sm:$0xf0] }
  0x7b   :  { %1418 = vmatpush.bf16.msrb.mxu2 %v2607_v44  ;;  %v2751_v39 = vor.u32 %v3100_v37, %v2748_v38  ;;  %v2498_v44 = vld [vmem:[#allocation4 + $0x1a8] sm:$0xf]  ;;  %v3039_v37 = vld [vmem:[#allocation4 + $0x1b4] sm:$0xf0] }
  0x7c   :  { %1406 = vmatpush.bf16.msrb.mxu1 %v2479_v42  ;;  %v2591_v42 = vor.u32 %v3060_v40, %v2588_v41  ;;  %v2338_v38 = vld [vmem:[#allocation4 + $0x68] sm:$0xf]  ;;  %v2499_v40 = vor.u32 %v3039_v37, %v2498_v44  ;;  %v2372_v44 = vld [vmem:[#allocation4 + $0xb8] sm:$0xf0]  ;;  %v3041_v37 = vld [vmem:[#allocation4 + $0x1cc] sm:$0xf] }
  0x7d   :  { %1429 = vmatpush.bf16.msrb.mxu3 %v2751_v39  ;;  %v2999_v39 = vld [vmem:[#allocation4 + $0x74] sm:$0xf0] }
  0x7e   :  { %1395 = vmatpush.bf16.msrb.mxu0 %v2335_v43  ;;  %v3096_v43 = vld [vmem:[#allocation4 + $0x384] sm:$0xf]  ;;  %v2339_v41 = vor.u32 %v2999_v39, %v2338_v38 }
  0x7f   :  { %1419 = vmatpush.bf16.msrb.mxu2 %v2591_v42  ;;  %v2482_v42 = vld [vmem:[#allocation4 + $0x188] sm:$0xf] }
  0x80   :  { %1407 = vmatpush.bf16.msrb.mxu1 %v2463_v53  ;;  %v2716_v53 = vld [vmem:[#allocation4 + $0x370] sm:$0xf0] }
  0x81   :  { %v2719_v54 = vor.u32 %v3092_v52, %v2716_v53  ;;  %v2306_v52 = vld [vmem:[#allocation4 + $0x28] sm:$0xf]  ;;  %v2991_v53 = vld [vmem:[#allocation4 + $0x34] sm:$0xf0] }
  0x82   :  { %1396 = vmatpush.bf16.msrb.mxu0 %v2319_v51  ;;  %v2735_v51 = vor.u32 %v3096_v43, %v2732_v45  ;;  %v3035_v43 = vld [vmem:[#allocation4 + $0x194] sm:$0xf0]  ;;  %v2322_v45 = vld [vmem:[#allocation4 + $0x48] sm:$0xf]  ;;  %v2307_v56 = vor.u32 %v2991_v53, %v2306_v52  ;;  %v2356_v52 = vld [vmem:[#allocation4 + $0x98] sm:$0xf0] }
  0x83   :  { %1420 = vmatpush.bf16.msrb.mxu2 %v2575_v49  ;;  %v2483_v47 = vor.u32 %v3035_v43, %v2482_v42  ;;  %v2466_v49 = vld [vmem:[#allocation4 + $0x168] sm:$0xf]  ;;  %v3107_v43 = vld [vmem:[#allocation4 + $0x3d4] sm:$0xf0] }
  0x84   :  { %1408 = vmatpush.bf16.msrb.mxu1 %v2447_v1  ;;  %1430 = vmatpush.bf16.msrb.mxu3 %v2735_v51  ;;  %v2703_v1 = vor.u32 %v3088_v60, %v2700_v61  ;;  %v2995_v51 = vld [vmem:[#allocation4 + $0x54] sm:$0xf0]  ;;  %v2290_v60 = vld [vmem:[#allocation4 + $0x8] sm:$0xf] }
  0x85   :  { %v2323_v48 = vor.u32 %v2995_v51, %v2322_v45  ;;  %v2987_v61 = vld [vmem:[#allocation4 + $0x14] sm:$0xf0]  ;;  %v2770_v42 = vld [vmem:[#allocation4 + $0x3c8] sm:$0xf] }
  0x86   :  { %1397 = vmatpush.bf16.msrb.mxu0 %v2303_v59  ;;  %v2771_v53 = vor.u32 %v3107_v43, %v2770_v42  ;;  %v2436_v42 = vld [vmem:[#allocation4 + $0x138] sm:$0xf0] }
  0x87   :  { %1421 = vmatpush.bf16.msrb.mxu2 %v2559_v58  ;;  %v3027_v58 = vld [vmem:[#allocation4 + $0x154] sm:$0xf0] }
  0x88   :  { %1409 = vmatpush.bf16.msrb.mxu1 %v2431_v16  ;;  %1431 = vmatpush.bf16.msrb.mxu3 %v2719_v54  ;;  %v2530_v16 = vld [vmem:[#allocation4 + $0x1e8] sm:$0xf]  ;;  %v132_v54 = vperm.slane %v3284_v46, 2 }
  0x89   :  { %v2531_v28 = vor.u32 %v3047_v20, %v2530_v16 }
  0x8a   :  { %1398 = vmatpush.bf16.msrb.mxu0 %v2287_v9  ;;  %v2386_v9 = vld [vmem:[#allocation4 + $0xc8] sm:$0xf] }
  0x8b   :  { %1422 = vmatpush.bf16.msrb.mxu2 %v2543_v6  ;;  %v2387_v19 = vor.u32 %v3011_v10, %v2386_v9  ;;  %v2291_v6 = vor.u32 %v2987_v61, %v2290_v60  ;;  %v133_v9 = vperm.slane %v3284_v46, 3  ;;  %v2407_v10 = vor.u32 %v3013_v63, %v2404_v0  ;;  %v2594_v60 = vld [vmem:[#allocation4 + $0x268] sm:$0xf]  ;;  %v3063_v61 = vld [vmem:[#allocation4 + $0x274] sm:$0xf0] }
  0x8c   :  { %1410 = vmatpush.bf16.msrb.mxu1 %v2415_v26  ;;  %1432 = vmatpush.bf16.msrb.mxu3 %v2703_v1  ;;  %v2671_v26 = vor.u32 %v3080_v21, %v2668_v22  ;;  %v2418_v21 = vld [vmem:[#allocation4 + $0x108] sm:$0xf]  ;;  %v3019_v22 = vld [vmem:[#allocation4 + $0x114] sm:$0xf0]  ;;  %v2997_v63 = vld [vmem:[#allocation4 + $0x6c] sm:$0xf]  ;;  %v2595_v4 = vor.u32 %v3063_v61, %v2594_v60 }
  0x8d   :  { %v2419_v31 = vor.u32 %v3019_v22, %v2418_v21  ;;  %v2340_v0 = vld [vmem:[#allocation4 + $0x78] sm:$0xf0]  ;;  %v2562_v22 = vld [vmem:[#allocation4 + $0x228] sm:$0xf]  ;;  %v3109_v60 = vld [vmem:[#allocation4 + $0x3ec] sm:$0xf] }
  0x8e   :  { %v2788_v61 = vld [vmem:[#allocation4 + $0x3f8] sm:$0xf0] }
  0x90   :  { %1433 = vmatpush.bf16.msrb.mxu3 %v2687_v17  ;;  %v2642_v17 = vld [vmem:[#allocation4 + $0x2c8] sm:$0xf] }
  0x94   :  { %1434 = vmatpush.bf16.msrb.mxu3 %v2671_v26 }
  0xaa   :  { %v467_v57 = vpop.f32.mrf.mxu0 }
  0xab   :  { %v468_v59 = vadd.f32 %v467_v57, %v130_v50  ;;  %v3031_v50 = vld [vmem:[#allocation4 + $0x174] sm:$0xf0]  ;;  %v2450_v57 = vld [vmem:[#allocation4 + $0x148] sm:$0xf] }
  0xac   :  { %v479_v62 = vpop.f32.mrf.mxu1  ;;  %v2467_v55 = vor.u32 %v3031_v50, %v2466_v49  ;;  %v3001_v50 = vld [vmem:[#allocation4 + $0x8c] sm:$0xf] }
  0xad   :  { %v480_v2 = vadd.f32 %v479_v62, %v468_v59 }
  0xaf   :  { %vm554_vm0 = vcmp.gt.f32.partialorder %v480_v2, 0.0  ;;  %v558_v7 = vmul.f32 0.2, %v480_v2 }
  0xb1   :  { %v491_v12 = vpop.f32.mrf.mxu2  ;;  %v3288_v13 = vsel %vm554_vm0, %v480_v2, %v558_v7  ;;  %v2451_v2 = vor.u32 %v3027_v58, %v2450_v57  ;;  %v2434_v7 = vld [vmem:[#allocation4 + $0x128] sm:$0xf]  ;;  %v3103_v58 = vld [vmem:[#allocation4 + $0x3b4] sm:$0xf0] }
  0xb2   :  { %v492_v15 = vadd.f32 %v491_v12, %v131_v5  ;;  %1351 = vmatmul.f32.vlgmr.msra.gmra.mxu0 %v3288_v13  ;;  %v2754_v57 = vld [vmem:[#allocation4 + $0x3a8] sm:$0xf] }
  0xb3   :  { %1439 = vmatpush.bf16.msra.mxu0 %v2403_v8  ;;  %v3023_v8 = vld [vmem:[#allocation4 + $0x134] sm:$0xf0] }
  0xb4   :  { %v503_v18 = vpop.f32.mrf.mxu3  ;;  %v2435_v16 = vor.u32 %v3023_v8, %v2434_v7  ;;  %v2343_v7 = vor.u32 %v2997_v63, %v2340_v0  ;;  %v2578_v8 = vld [vmem:[#allocation4 + $0x248] sm:$0xf]  ;;  %v3069_v63 = vld [vmem:[#allocation4 + $0x2ac] sm:$0xf]  ;;  %v2628_v0 = vld [vmem:[#allocation4 + $0x2b8] sm:$0xf0] }
  0xb5   :  { %v504_v23 = vadd.f32 %v503_v18, %v492_v15  ;;  %v2388_v15 = vld [vmem:[#allocation4 + $0xd8] sm:$0xf0]  ;;  %v3075_v18 = vld [vmem:[#allocation4 + $0x2d4] sm:$0xf0] }
  0xb6   :  { %v2391_v46 = vor.u32 %v3009_v11, %v2388_v15  ;;  %v2993_v11 = vld [vmem:[#allocation4 + $0x4c] sm:$0xf] }
  0xb7   :  { %vm555_vm1 = vcmp.gt.f32.partialorder %v504_v23, 0.0  ;;  %v559_v27 = vmul.f32 0.2, %v504_v23  ;;  %1440 = vmatpush.bf16.msra.mxu0 %v2387_v19  ;;  %v3029_v15 = vld [vmem:[#allocation4 + $0x16c] sm:$0xf] }
  0xb9   :  { %v3291_v32 = vsel %vm555_vm1, %v504_v23, %v559_v27  ;;  %v2643_v27 = vor.u32 %v3075_v18, %v2642_v17  ;;  %v2722_v18 = vld [vmem:[#allocation4 + $0x368] sm:$0xf] }
  0xba   :  { %1363 = vmatmul.f32.vlgmr.msra.gmra.mxu1 %v3291_v32  ;;  %1399 = vmatmul.f32.vlgmr.msrb.gmra.mxu0 %v3288_v13 }
  0xbb   :  { %1451 = vmatpush.bf16.msra.mxu1 %v2531_v28  ;;  %1441 = vmatpush.bf16.msra.mxu0 %v2371_v29  ;;  %v2786_v28 = vld [vmem:[#allocation4 + $0x3e8] sm:$0xf]  ;;  %v3111_v29 = vld [vmem:[#allocation4 + $0x3f4] sm:$0xf0] }
  0xbc   :  { %v2787_v39 = vor.u32 %v3111_v29, %v2786_v28  ;;  %v2452_v28 = vld [vmem:[#allocation4 + $0x158] sm:$0xf0] }
  0xbf   :  { %1452 = vmatpush.bf16.msra.mxu1 %v2515_v35  ;;  %1442 = vmatpush.bf16.msra.mxu0 %v2355_v36  ;;  %v2535_v35 = vor.u32 %v3045_v24, %v2532_v25  ;;  %v3005_v36 = vld [vmem:[#allocation4 + $0xac] sm:$0xf]  ;;  %v2308_v25 = vld [vmem:[#allocation4 + $0x38] sm:$0xf0] }
  0xc0   :  { %v2375_v51 = vor.u32 %v3005_v36, %v2372_v44  ;;  %v2989_v24 = vld [vmem:[#allocation4 + $0x2c] sm:$0xf] }
  0xc1   :  { %v2985_v36 = vld [vmem:[#allocation4 + $0xc] sm:$0xf] }
  0xc2   :  { %1411 = vmatmul.f32.vlgmr.msrb.gmra.mxu1 %v3291_v32 }
  0xc3   :  { %1453 = vmatpush.bf16.msra.mxu1 %v2499_v40  ;;  %1443 = vmatpush.bf16.msra.mxu0 %v2339_v41  ;;  %v2516_v40 = vld [vmem:[#allocation4 + $0x1d8] sm:$0xf0]  ;;  %v2627_v41 = vor.u32 %v3071_v34, %v2626_v33  ;;  %v2311_v33 = vor.u32 %v2989_v24, %v2308_v25  ;;  %v2546_v34 = vld [vmem:[#allocation4 + $0x208] sm:$0xf] }
  0xc4   :  { %v2519_v49 = vor.u32 %v3041_v37, %v2516_v40  ;;  %v2292_v37 = vld [vmem:[#allocation4 + $0x18] sm:$0xf0] }
  0xc5   :  { %v2564_v24 = vld [vmem:[#allocation4 + $0x238] sm:$0xf0] }
  0xc7   :  { %1454 = vmatpush.bf16.msra.mxu1 %v2483_v47  ;;  %1444 = vmatpush.bf16.msra.mxu0 %v2323_v48  ;;  %v2610_v47 = vld [vmem:[#allocation4 + $0x288] sm:$0xf]  ;;  %v3067_v48 = vld [vmem:[#allocation4 + $0x294] sm:$0xf0] }
  0xca   :  { %v515_v59 = vpop.f32.mrf.mxu0 }
  0xcb   :  { %v516_v62 = vadd.f32 %v515_v59, %v132_v54  ;;  %1455 = vmatpush.bf16.msra.mxu1 %v2467_v55  ;;  %1445 = vmatpush.bf16.msra.mxu0 %v2307_v56  ;;  %v3037_v54 = vld [vmem:[#allocation4 + $0x1ac] sm:$0xf]  ;;  %v2500_v55 = vld [vmem:[#allocation4 + $0x1b8] sm:$0xf0]  ;;  %v2611_v56 = vor.u32 %v3067_v48, %v2610_v47  ;;  %v2359_v59 = vor.u32 %v3001_v50, %v2356_v52  ;;  %v3087_v47 = vld [vmem:[#allocation4 + $0x334] sm:$0xf0] }
  0xcc   :  { %v527_v1 = vpop.f32.mrf.mxu1  ;;  %v2295_v48 = vor.u32 %v2985_v36, %v2292_v37  ;;  %v3073_v52 = vld [vmem:[#allocation4 + $0x2cc] sm:$0xf]  ;;  %v2676_v37 = vld [vmem:[#allocation4 + $0x318] sm:$0xf0] }
  0xcd   :  { %v528_v5 = vadd.f32 %v527_v1, %v516_v62  ;;  %v2503_v62 = vor.u32 %v3037_v54, %v2500_v55  ;;  %v2755_v1 = vor.u32 %v3103_v58, %v2754_v57  ;;  %v3017_v55 = vld [vmem:[#allocation4 + $0x10c] sm:$0xf]  ;;  %v2674_v57 = vld [vmem:[#allocation4 + $0x308] sm:$0xf]  ;;  %v3083_v58 = vld [vmem:[#allocation4 + $0x314] sm:$0xf0] }
  0xcf   :  { %vm556_vm2 = vcmp.gt.f32.partialorder %v528_v5, 0.0  ;;  %v560_v12 = vmul.f32 0.2, %v528_v5  ;;  %1456 = vmatpush.bf16.msra.mxu1 %v2451_v2  ;;  %1446 = vmatpush.bf16.msra.mxu0 %v2291_v6  ;;  %v3033_v2 = vld [vmem:[#allocation4 + $0x18c] sm:$0xf] }
  0xd0   :  { %v3099_v6 = vld [vmem:[#allocation4 + $0x394] sm:$0xf0] }
  0xd1   :  { %v539_v19 = vpop.f32.mrf.mxu2  ;;  %v3298_v20 = vsel %vm556_vm2, %v528_v5, %v560_v12  ;;  %v2738_v5 = vld [vmem:[#allocation4 + $0x388] sm:$0xf]  ;;  %v2324_v12 = vld [vmem:[#allocation4 + $0x58] sm:$0xf0] }
  0xd2   :  { %v540_v23 = vadd.f32 %v539_v19, %v133_v9  ;;  %1375 = vmatmul.f32.vlgmr.msra.gmra.mxu2 %v3298_v20  ;;  %1447 = vmatmul.f32.vlgmr.msra.gmra.mxu0 %v3288_v13  ;;  %v3059_v9 = vld [vmem:[#allocation4 + $0x254] sm:$0xf0]  ;;  %v2327_v21 = vor.u32 %v2993_v11, %v2324_v12  ;;  %v2756_v11 = vld [vmem:[#allocation4 + $0x3b8] sm:$0xf0] }
  0xd3   :  { %1487 = vmatpush.bf16.msrb.mxu0 %v2407_v10  ;;  %v551_v26 = vpop.f32.mrf.mxu3  ;;  %1463 = vmatpush.bf16.msra.mxu2 %v2659_v14  ;;  %v2487_v10 = vor.u32 %v3033_v2, %v2484_v3  ;;  %v2739_v14 = vor.u32 %v3099_v6, %v2738_v5  ;;  %v2579_v17 = vor.u32 %v3059_v9, %v2578_v8  ;;  %v3095_v19 = vld [vmem:[#allocation4 + $0x374] sm:$0xf0]  ;;  %v2772_v5 = vld [vmem:[#allocation4 + $0x3d8] sm:$0xf0]  ;;  %v3065_v6 = vld [vmem:[#allocation4 + $0x28c] sm:$0xf] }
  0xd4   :  { %v552_v30 = vadd.f32 %v551_v26, %v540_v23  ;;  %1457 = vmatpush.bf16.msra.mxu1 %v2435_v16  ;;  %v2468_v16 = vld [vmem:[#allocation4 + $0x178] sm:$0xf0]  ;;  %v3055_v23 = vld [vmem:[#allocation4 + $0x234] sm:$0xf0]  ;;  %v2723_v26 = vor.u32 %v3095_v19, %v2722_v18  ;;  %v2791_v2 = vor.u32 %v3109_v60, %v2788_v61  ;;  %v2631_v3 = vor.u32 %v3069_v63, %v2628_v0  ;;  %v3057_v18 = vld [vmem:[#allocation4 + $0x24c] sm:$0xf] }
  0xd5   :  { %v2563_v29 = vor.u32 %v3055_v23, %v2562_v22  ;;  %v2596_v12 = vld [vmem:[#allocation4 + $0x278] sm:$0xf0]  ;;  %v3093_v22 = vld [vmem:[#allocation4 + $0x36c] sm:$0xf] }
  0xd6   :  { %vm557_vm3 = vcmp.gt.f32.partialorder %v552_v30, 0.0  ;;  %v561_v38 = vmul.f32 0.2, %v552_v30  ;;  %v2580_v19 = vld [vmem:[#allocation4 + $0x258] sm:$0xf0] }
  0xd7   :  { %1488 = vmatpush.bf16.msrb.mxu0 %v2391_v46  ;;  %1464 = vmatpush.bf16.msra.mxu2 %v2643_v27  ;;  %v2471_v46 = vor.u32 %v3029_v15, %v2468_v16  ;;  %v3025_v27 = vld [vmem:[#allocation4 + $0x14c] sm:$0xf]  ;;  %v2724_v23 = vld [vmem:[#allocation4 + $0x378] sm:$0xf0] }
  0xd8   :  { %1458 = vmatpush.bf16.msra.mxu1 %v2419_v31  ;;  %v3302_v45 = vsel %vm557_vm3, %v552_v30, %v561_v38  ;;  %v2706_v30 = vld [vmem:[#allocation4 + $0x348] sm:$0xf]  ;;  %v3091_v31 = vld [vmem:[#allocation4 + $0x354] sm:$0xf0]  ;;  %v2455_v44 = vor.u32 %v3025_v27, %v2452_v28  ;;  %v3077_v38 = vld [vmem:[#allocation4 + $0x2ec] sm:$0xf]  ;;  %v2727_v25 = vor.u32 %v3093_v22, %v2724_v23 }
  0xd9   :  { %1387 = vmatmul.f32.vlgmr.msra.gmra.mxu3 %v3302_v45  ;;  %v2707_v40 = vor.u32 %v3091_v31, %v2706_v30  ;;  %v3097_v16 = vld [vmem:[#allocation4 + $0x38c] sm:$0xf]  ;;  %v2708_v28 = vld [vmem:[#allocation4 + $0x358] sm:$0xf0] }
  0xda   :  { %1475 = vmatpush.bf16.msra.mxu3 %v2787_v39  ;;  %1423 = vmatmul.f32.vlgmr.msrb.gmra.mxu2 %v3298_v20  ;;  %v2660_v39 = vld [vmem:[#allocation4 + $0x2f8] sm:$0xf0]  ;;  %v3089_v27 = vld [vmem:[#allocation4 + $0x34c] sm:$0xf] }
  0xdb   :  { %1459 = vmatmul.f32.vlgmr.msra.gmra.mxu1 %v3291_v32  ;;  %1465 = vmatpush.bf16.msra.mxu2 %v2627_v41  ;;  %v3021_v41 = vld [vmem:[#allocation4 + $0x12c] sm:$0xf]  ;;  %v2548_v30 = vld [vmem:[#allocation4 + $0x218] sm:$0xf0]  ;;  %v2711_v31 = vor.u32 %v3089_v27, %v2708_v28 }
  0xdc   :  { %1499 = vmatpush.bf16.msrb.mxu1 %v2535_v35  ;;  %1489 = vmatpush.bf16.msrb.mxu0 %v2375_v51  ;;  %v3051_v35 = vld [vmem:[#allocation4 + $0x214] sm:$0xf0]  ;;  %v2690_v51 = vld [vmem:[#allocation4 + $0x328] sm:$0xf]  ;;  %v2439_v50 = vor.u32 %v3021_v41, %v2436_v42 }
  0xdd   :  { %v2547_v43 = vor.u32 %v3051_v35, %v2546_v34  ;;  %v2691_v54 = vor.u32 %v3087_v47, %v2690_v51  ;;  %v3085_v34 = vld [vmem:[#allocation4 + $0x32c] sm:$0xf]  ;;  %v2692_v35 = vld [vmem:[#allocation4 + $0x338] sm:$0xf0] }
  0xde   :  { %1476 = vmatpush.bf16.msra.mxu3 %v2771_v53  ;;  %v2644_v53 = vld [vmem:[#allocation4 + $0x2d8] sm:$0xf0]  ;;  %v2695_v36 = vor.u32 %v3085_v34, %v2692_v35 }
  0xdf   :  { %1466 = vmatpush.bf16.msra.mxu2 %v2611_v56  ;;  %v2420_v56 = vld [vmem:[#allocation4 + $0x118] sm:$0xf0] }
  0xe0   :  { %1500 = vmatpush.bf16.msrb.mxu1 %v2519_v49  ;;  %1490 = vmatpush.bf16.msrb.mxu0 %v2359_v59  ;;  %v2663_v49 = vor.u32 %v3077_v38, %v2660_v39  ;;  %v2647_v59 = vor.u32 %v3073_v52, %v2644_v53  ;;  %v3317_v39 = vld [vmem:[%s3475_s4 + $0x1] ss:$8 sm:$0xf] }
  0xe1   :  { %1435 = vmatmul.f32.vlgmr.msrb.gmra.mxu3 %v3302_v45  ;;  %v695_v42 = vperm.slane %v3317_v39, 0  ;;  %v697_v27 = vperm.slane %v3317_v39, 2 }
  0xe2   :  { %1477 = vmatpush.bf16.msra.mxu3 %v2755_v1  ;;  %v2675_v1 = vor.u32 %v3083_v58, %v2674_v57 }
  0xe3   :  { %1467 = vmatpush.bf16.msra.mxu2 %v2595_v4  ;;  %v3105_v4 = vld [vmem:[#allocation4 + $0x3cc] sm:$0xf] }
  0xe4   :  { %1501 = vmatpush.bf16.msrb.mxu1 %v2503_v62  ;;  %1491 = vmatpush.bf16.msrb.mxu0 %v2343_v7  ;;  %v2423_v62 = vor.u32 %v3017_v55, %v2420_v56  ;;  %v2612_v7 = vld [vmem:[#allocation4 + $0x298] sm:$0xf0]  ;;  %v2775_v8 = vor.u32 %v3105_v4, %v2772_v5  ;;  %v3117_v5 = vld [vmem:[%s3474_s3 + $0x28] sm:$0xff] }
  0xe5   :  { %v2615_v9 = vor.u32 %v3065_v6, %v2612_v7  ;;  %v3119_v55 = vld [vmem:[%s3474_s3 + $0x38] sm:$0xff] }
  0xe6   :  { %1478 = vmatpush.bf16.msra.mxu3 %v2739_v14  ;;  %v3127_v6 = vld [vmem:[%s3474_s3 + $0x78] sm:$0xff] }
  0xe7   :  { %1468 = vmatpush.bf16.msra.mxu2 %v2579_v17  ;;  %v2740_v17 = vld [vmem:[#allocation4 + $0x398] sm:$0xf0] }
  0xe8   :  { %1502 = vmatpush.bf16.msrb.mxu1 %v2487_v10  ;;  %1492 = vmatpush.bf16.msrb.mxu0 %v2327_v21  ;;  %v3101_v10 = vld [vmem:[#allocation4 + $0x3ac] sm:$0xf]  ;;  %v2743_v21 = vor.u32 %v3097_v16, %v2740_v17 }
  0xe9   :  { %v2759_v14 = vor.u32 %v3101_v10, %v2756_v11 }
  0xea   :  { %1479 = vmatpush.bf16.msra.mxu3 %v2723_v26 }
  0xeb   :  { %1469 = vmatpush.bf16.msra.mxu2 %v2563_v29  ;;  %v3049_v29 = vld [vmem:[#allocation4 + $0x20c] sm:$0xf] }
  0xec   :  { %1503 = vmatpush.bf16.msrb.mxu1 %v2471_v46  ;;  %1493 = vmatpush.bf16.msrb.mxu0 %v2311_v33  ;;  %v3053_v46 = vld [vmem:[#allocation4 + $0x22c] sm:$0xf]  ;;  %v2551_v33 = vor.u32 %v3049_v29, %v2548_v30 }
  0xed   :  { %v2567_v26 = vor.u32 %v3053_v46, %v2564_v24  ;;  %v3114_v46 = vld [vmem:[%s3474_s3 + $0x10] sm:$0xff]  ;;  %v3124_v24 = vld [vmem:[%s3474_s3 + $0x60] sm:$0xff] }
  0xee   :  { %1480 = vmatpush.bf16.msra.mxu3 %v2707_v40  ;;  %v3219_v40 = vmov 8.0  }
  0xef   :  { %1470 = vmatpush.bf16.msra.mxu2 %v2547_v43  ;;  %3151 = vrcp.f32 %v3219_v40 }
  0xf0   :  { %1504 = vmatpush.bf16.msrb.mxu1 %v2455_v44  ;;  %1494 = vmatpush.bf16.msrb.mxu0 %v2295_v48  ;;  %v3081_v44 = vld [vmem:[#allocation4 + $0x30c] sm:$0xf] }
  0xf1   :  { %v2679_v38 = vor.u32 %v3081_v44, %v2676_v37 }
  0xf2   :  { %1481 = vmatpush.bf16.msra.mxu3 %v2691_v54  ;;  %1471 = vmatmul.f32.vlgmr.msra.gmra.mxu2 %v3298_v20 }
  0xf3   :  { %1511 = vmatpush.bf16.msrb.mxu2 %v2663_v49  ;;  %1495 = vmatmul.f32.vlgmr.msrb.gmra.mxu0 %v3288_v13  ;;  %v3061_v13 = vld [vmem:[#allocation4 + $0x26c] sm:$0xf] }
  0xf4   :  { %1505 = vmatpush.bf16.msrb.mxu1 %v2439_v50  ;;  %v2599_v15 = vor.u32 %v3061_v13, %v2596_v12  ;;  %v696_v50 = vperm.slane %v3317_v39, 1  ;;  %1948 = vmatpush.bf16.msra.mxu0 %v3119_v55  ;;  %v3116_v13 = vld [vmem:[%s3474_s3 + $0x20] sm:$0xff]  ;;  %v3126_v12 = vld [vmem:[%s3474_s3 + $0x70] sm:$0xff] }
  0xf5   :  { %v3152_v51 = vpop.eup %3151 }
  0xf6   :  { %1482 = vmatpush.bf16.msra.mxu3 %v2675_v1  ;;  %v1560_v49 = vmul.f32 8.0, %v3152_v51  ;;  %vm1564_vm4 = vweird.f32 %v3152_v51 }
  0xf7   :  { %1512 = vmatpush.bf16.msrb.mxu2 %v2647_v59 }
  0xf8   :  { %1506 = vmatpush.bf16.msrb.mxu1 %v2423_v62  ;;  %v1561_v54 = vsub.f32 1.0, %v1560_v49  ;;  %v3118_v62 = vld [vmem:[%s3474_s3 + $0x30] sm:$0xff] }
  0xf9   :  { %1483 = vmatmul.f32.vlgmr.msra.gmra.mxu3 %v3302_v45  ;;  %1949 = vmatpush.bf16.msra.mxu0 %v3118_v62 }
  0xfa   :  { %1523 = vmatpush.bf16.msrb.mxu3 %v2791_v2  ;;  %v1562_v60 = vmul.f32 %v3152_v51, %v1561_v54 }
  0xfb   :  { %1507 = vmatmul.f32.vlgmr.msrb.gmra.mxu1 %v3291_v32  ;;  %1513 = vmatpush.bf16.msrb.mxu2 %v2631_v3  ;;  %v2583_v32 = vor.u32 %v3057_v18, %v2580_v19  ;;  %v3115_v18 = vld [vmem:[%s3474_s3 + $0x18] sm:$0xff]  ;;  %v3125_v19 = vld [vmem:[%s3474_s3 + $0x68] sm:$0xff] }
  0xfc   :  { %v1563_v3 = vadd.f32 %v3152_v51, %v1562_v60  ;;  %1960 = vmatpush.bf16.msra.mxu1 %v3127_v6  ;;  %v3120_v60 = vld [vmem:[%s3474_s3 + $0x40] sm:$0xff] }
  0xfd   :  { %1950 = vmatpush.bf16.msra.mxu0 %v3117_v5 }
  0xfe   :  { %1524 = vmatpush.bf16.msrb.mxu3 %v2775_v8  ;;  %v3333_v11 = vsel %vm1564_vm4, %v3152_v51, %v1563_v3 }
  0xff   :  { %1514 = vmatpush.bf16.msrb.mxu2 %v2615_v9 }
 0x100   :  { %1961 = vmatpush.bf16.msra.mxu1 %v3126_v12  ;;  %v3131_v12 = vld [vmem:[%s3474_s3 + $0x98] sm:$0xff] }
 0x101   :  { %1951 = vmatpush.bf16.msra.mxu0 %v3116_v13 }
 0x102   :  { %1525 = vmatpush.bf16.msrb.mxu3 %v2759_v14 }
 0x103   :  { %1515 = vmatpush.bf16.msrb.mxu2 %v2599_v15 }
 0x104   :  { %1962 = vmatpush.bf16.msra.mxu1 %v3125_v19 }
 0x105   :  { %1952 = vmatpush.bf16.msra.mxu0 %v3115_v18 }
 0x106   :  { %1526 = vmatpush.bf16.msrb.mxu3 %v2743_v21 }
 0x107   :  { %1516 = vmatpush.bf16.msrb.mxu2 %v2583_v32 }
 0x108   :  { %1963 = vmatpush.bf16.msra.mxu1 %v3124_v24  ;;  %v3416_v24 = vld [vmem:[%s3475_s4 + $0x3] ss:$8 sm:$0xf] }
 0x109   :  { %1953 = vmatpush.bf16.msra.mxu0 %v3114_v46  ;;  %v698_v46 = vperm.slane %v3317_v39, 3  ;;  %v3129_v39 = vld [vmem:[%s3474_s3 + $0x88] sm:$0xff] }
 0x10a   :  { %1527 = vmatpush.bf16.msrb.mxu3 %v2727_v25 }
 0x10b   :  { %1517 = vmatpush.bf16.msrb.mxu2 %v2567_v26 }
 0x10e   :  { %1528 = vmatpush.bf16.msrb.mxu3 %v2711_v31  ;;  %v3113_v31 = vld [vmem:[%s3474_s3 + $0x8] sm:$0xff] }
 0x10f   :  { %1518 = vmatpush.bf16.msrb.mxu2 %v2551_v33  ;;  %v3123_v33 = vld [vmem:[%s3474_s3 + $0x58] sm:$0xff]  ;;  %1954 = vmatpush.bf16.msra.mxu0 %v3113_v31 }
 0x110   :  { %1964 = vmatpush.bf16.msra.mxu1 %v3123_v33 }
 0x112   :  { %1529 = vmatpush.bf16.msrb.mxu3 %v2695_v36  ;;  %1519 = vmatmul.f32.vlgmr.msrb.gmra.mxu2 %v3298_v20 }
 0x116   :  { %1530 = vmatpush.bf16.msrb.mxu3 %v2679_v38 }
 0x119   :  { %1531 = vmatmul.f32.vlgmr.msrb.gmra.mxu3 %v3302_v45 }
 0x12f   :  { %v1352_v41 = vpop.f32.mrf.mxu0 }
 0x130   :  { %v1353_v47 = vadd.f32 %v1352_v41, %v695_v42  ;;  %v3112_v41 = vld [vmem:[%s3474_s3] sm:$0xff]  ;;  %v3122_v42 = vld [vmem:[%s3474_s3 + $0x50] sm:$0xff] }
 0x131   :  { %1955 = vmatpush.bf16.msra.mxu0 %v3112_v41  ;;  %1965 = vmatpush.bf16.msra.mxu1 %v3122_v42 }
 0x137   :  { %v1364_v43 = vpop.f32.mrf.mxu1  ;;  %v1400_v52 = vpop.f32.mrf.mxu0 }
 0x138   :  { %v1365_v20 = vadd.f32 %v1364_v43, %v1353_v47  ;;  %v1401_v56 = vadd.f32 %v1400_v52, %v696_v50  ;;  %v3135_v50 = vld [vmem:[%s3474_s3 + $0xb8] sm:$0xff] }
 0x139   :  { %1972 = vmatpush.bf16.msra.mxu2 %v3135_v50 }
 0x13f   :  { %v1412_v58 = vpop.f32.mrf.mxu1 }
 0x140   :  { %v1413_v63 = vadd.f32 %v1412_v58, %v1401_v56 }
 0x14f   :  { %v1448_v30 = vpop.f32.mrf.mxu0 }
 0x150   :  { %v1449_v44 = vadd.f32 %v1448_v30, %v697_v27 }
 0x155   :  { %v1376_v48 = vpop.f32.mrf.mxu2 }
 0x156   :  { %v1377_v45 = vadd.f32 %v1376_v48, %v1365_v20 }
 0x158   :  { %v1460_v36 = vpop.f32.mrf.mxu1 }
 0x159   :  { %v1461_v43 = vadd.f32 %v1460_v36, %v1449_v44 }
 0x15c   :  { %v1388_v53 = vpop.f32.mrf.mxu3 }
 0x15d   :  { %v1389_v57 = vadd.f32 %v1388_v53, %v1377_v45  ;;  %v1424_v61 = vpop.f32.mrf.mxu2  ;;  %v3121_v45 = vld [vmem:[%s3474_s3 + $0x48] sm:$0xff] }
 0x15e   :  { %v1425_v2 = vadd.f32 %v1424_v61, %v1413_v63  ;;  %1966 = vmatpush.bf16.msra.mxu1 %v3121_v45 }
 0x15f   :  { %v1535_v59 = vrot.slane %v1389_v57, 4 }
 0x161   :  { %v1536_v0 = vadd.f32 %v1535_v59, %v1389_v57  ;;  %v3134_v59 = vld [vmem:[%s3474_s3 + $0xb0] sm:$0xff] }
 0x162   :  { %1973 = vmatpush.bf16.msra.mxu2 %v3134_v59  ;;  %1967 = vmatpush.bf16.msra.mxu1 %v3120_v60  ;;  %v3142_v60 = vld [vmem:[%s3474_s3 + $0xf0] sm:$0xff] }
 0x163   :  { %v1537_v1 = vrot.slane %v1536_v0, 2 }
 0x164   :  { %v1436_v4 = vpop.f32.mrf.mxu3 }
 0x165   :  { %v1538_v7 = vadd.f32 %v1537_v1, %v1536_v0  ;;  %v1437_v8 = vadd.f32 %v1436_v4, %v1425_v2  ;;  %v3133_v1 = vld [vmem:[%s3474_s3 + $0xa8] sm:$0xff] }
 0x166   :  { %1974 = vmatpush.bf16.msra.mxu2 %v3133_v1 }
 0x167   :  { %v1539_v9 = vrot.slane %v1538_v7, 1  ;;  %v1541_v10 = vrot.slane %v1437_v8, 4 }
 0x169   :  { %v1540_v14 = vadd.f32 %v1539_v9, %v1538_v7  ;;  %v1542_v15 = vadd.f32 %v1541_v10, %v1437_v8  ;;  %v3132_v7 = vld [vmem:[%s3474_s3 + $0xa0] sm:$0xff] }
 0x16a   :  { %1975 = vmatpush.bf16.msra.mxu2 %v3132_v7  ;;  %v3140_v7 = vld [vmem:[%s3474_s3 + $0xe0] sm:$0xff] }
 0x16b   :  { %v1566_v16 = vmul.f32 %v3333_v11, %v1540_v14  ;;  %v1543_v17 = vrot.slane %v1542_v15, 2 }
 0x16d   :  { %v3348_v21 = vsub.f32 %v1389_v57, %v1566_v16  ;;  %v1544_v32 = vadd.f32 %v1543_v17, %v1542_v15  ;;  %v3405_v16 = vld [vmem:[%s3475_s4 + $0x2] ss:$8 sm:$0xf] }
 0x16e   :  { %1976 = vmatpush.bf16.msra.mxu2 %v3131_v12  ;;  %v3139_v12 = vld [vmem:[%s3474_s3 + $0xd8] sm:$0xff] }
 0x16f   :  { %v1574_v22 = vmul.f32 %v3348_v21, %v3348_v21  ;;  %v1545_v23 = vrot.slane %v1544_v32, 1 }
 0x171   :  { %v1578_v25 = vrot.slane %v1574_v22, 4  ;;  %v1546_v26 = vadd.f32 %v1545_v23, %v1544_v32  ;;  %v3130_v32 = vld [vmem:[%s3474_s3 + $0x90] sm:$0xff] }
 0x172   :  { %1977 = vmatpush.bf16.msra.mxu2 %v3130_v32  ;;  %v3138_v32 = vld [vmem:[%s3474_s3 + $0xd0] sm:$0xff] }
 0x173   :  { %v1579_v28 = vadd.f32 %v1578_v25, %v1574_v22  ;;  %v1567_v29 = vmul.f32 %v3333_v11, %v1546_v26  ;;  %v1655_v25 = vperm.slane %v3405_v16, 0  ;;  %v1496_v26 = vpop.f32.mrf.mxu0 }
 0x174   :  { %v1497_v44 = vadd.f32 %v1496_v26, %v698_v46  ;;  %v3137_v26 = vld [vmem:[%s3474_s3 + $0xc8] sm:$0xff] }
 0x175   :  { %v1580_v34 = vrot.slane %v1579_v28, 2  ;;  %v3366_v35 = vsub.f32 %v1437_v8, %v1567_v29  ;;  %v1472_v40 = vpop.f32.mrf.mxu2 }
 0x176   :  { %v1473_v20 = vadd.f32 %v1472_v40, %v1461_v43  ;;  %1978 = vmatpush.bf16.msra.mxu2 %v3129_v39 }
 0x177   :  { %v1581_v37 = vadd.f32 %v1580_v34, %v1579_v28  ;;  %v1575_v38 = vmul.f32 %v3366_v35, %v3366_v35  ;;  %v1668_v34 = vperm.slane %v3416_v24, 0 }
 0x178   :  { %v1508_v31 = vpop.f32.mrf.mxu1 }
 0x179   :  { %v1582_v51 = vrot.slane %v1581_v37, 1  ;;  %v1584_v47 = vrot.slane %v1575_v38, 4  ;;  %v1509_v42 = vadd.f32 %v1508_v31, %v1497_v44 }
 0x17b   :  { %v1583_v48 = vadd.f32 %v1582_v51, %v1581_v37  ;;  %v1585_v49 = vadd.f32 %v1584_v47, %v1575_v38 }
 0x17c   :  { %v1484_v52 = vpop.f32.mrf.mxu3 }
 0x17d   :  { %v1602_v53 = vmul.f32 %v1583_v48, %v3333_v11  ;;  %v1586_v54 = vrot.slane %v1585_v49, 2  ;;  %v1485_v55 = vadd.f32 %v1484_v52, %v1473_v20  ;;  %v1656_v20 = vperm.slane %v3405_v16, 1 }
 0x17f   :  { %v1606_v56 = vadd.f32 1e-05, %v1602_v53  ;;  %v1587_v57 = vadd.f32 %v1586_v54, %v1585_v49  ;;  %v1547_v58 = vrot.slane %v1485_v55, 4  ;;  %v3143_v49 = vld [vmem:[%s3474_s3 + $0xf8] sm:$0xff] }
 0x180   :  { %1984 = vmatpush.bf16.msra.mxu3 %v3143_v49  ;;  %v1658_v49 = vperm.slane %v3405_v16, 3 }
 0x181   :  { %3153 = vrsqrt.f32 %v1606_v56  ;;  %v1588_v61 = vrot.slane %v1587_v57, 1  ;;  %v1548_v62 = vadd.f32 %v1547_v58, %v1485_v55  ;;  %vm1616_vm6 = vweird.f32 %v1606_v56 }
 0x182   :  { %v1669_v58 = vperm.slane %v3416_v24, 1 }
 0x183   :  { %v1589_v63 = vadd.f32 %v1588_v61, %v1587_v57  ;;  %v1549_v0 = vrot.slane %v1548_v62, 2 }
 0x184   :  { %1985 = vmatpush.bf16.msra.mxu3 %v3142_v60 }
 0x185   :  { %v1603_v2 = vmul.f32 %v1589_v63, %v3333_v11  ;;  %v1550_v3 = vadd.f32 %v1549_v0, %v1548_v62 }
 0x187   :  { %v3154_v4 = vpop.eup %3153  ;;  %v1607_v5 = vadd.f32 1e-05, %v1603_v2  ;;  %v1551_v6 = vrot.slane %v1550_v3, 1 }
 0x188   :  { %v1611_v8 = vmul.f32 %v3154_v4, %v1606_v56  ;;  %vm1617_vm5 = vweird.f32 %v3154_v4 }
 0x189   :  { %3155 = vrsqrt.f32 %v1607_v5  ;;  %v1552_v9 = vadd.f32 %v1551_v6, %v1550_v3  ;;  %vm1618_vm7 = vmor %vm1616_vm6, %vm1617_vm5  ;;  %vm1626_vm9 = vweird.f32 %v1607_v5  ;;  %vm2010_vm5 = vcmask 261120  }
 0x18a   :  { %v1612_v10 = vmul.f32 %v3154_v4, %v1611_v8  ;;  %vm2012_vm6 = vcmask 785408  }
 0x18b   :  { %v1568_v13 = vmul.f32 %v3333_v11, %v1552_v9 }
 0x18c   :  { %v1613_v14 = vmul.f32 0.5, %v1612_v10 }
 0x18d   :  { %v3400_v15 = vsub.f32 %v1485_v55, %v1568_v13 }
 0x18e   :  { %v1614_v17 = vsub.f32 1.5, %v1613_v14 }
 0x18f   :  { %v3156_v18 = vpop.eup %3155  ;;  %v1576_v19 = vmul.f32 %v3400_v15, %v3400_v15 }
 0x190   :  { %v1615_v22 = vmul.f32 %v3154_v4, %v1614_v17  ;;  %v1621_v23 = vmul.f32 %v3156_v18, %v1607_v5  ;;  %vm1627_vm8 = vweird.f32 %v3156_v18 }
 0x191   :  { %v1590_v27 = vrot.slane %v1576_v19, 4  ;;  %vm1628_vm10 = vmor %vm1626_vm9, %vm1627_vm8 }
 0x192   :  { %v1619_v28 = vsel %vm1618_vm7, %v3154_v4, %v1615_v22  ;;  %v1622_v29 = vmul.f32 %v3156_v18, %v1621_v23 }
 0x193   :  { %v1650_v30 = vmul.f32 %v1619_v28, %v3348_v21  ;;  %v1591_v33 = vadd.f32 %v1590_v27, %v1576_v19  ;;  %v3128_v21 = vld [vmem:[%s3474_s3 + $0x80] sm:$0xff]  ;;  %v1657_v27 = vperm.slane %v3405_v16, 2 }
 0x194   :  { %v1623_v36 = vmul.f32 0.5, %v1622_v29  ;;  %1979 = vmatpush.bf16.msra.mxu2 %v3128_v21 }
 0x195   :  { %v1663_v37 = vmul.f32 %v1655_v25, %v1650_v30  ;;  %v1592_v38 = vrot.slane %v1591_v33, 2  ;;  %v1520_v40 = vpop.f32.mrf.mxu2  ;;  %v3136_v30 = vld [vmem:[%s3474_s3 + $0xc0] sm:$0xff] }
 0x196   :  { %v1624_v41 = vsub.f32 1.5, %v1623_v36  ;;  %v1521_v48 = vadd.f32 %v1520_v40, %v1509_v42 }
 0x197   :  { %v1593_v43 = vadd.f32 %v1592_v38, %v1591_v33  ;;  %v1676_v51 = vadd.f32 %v1668_v34, %v1663_v37  ;;  %v1670_v33 = vperm.slane %v3416_v24, 2 }
 0x198   :  { %v1625_v47 = vmul.f32 %v3156_v18, %v1624_v41 }
 0x199   :  { %v1594_v50 = vrot.slane %v1593_v43, 1  ;;  %vm1680_vm11 = vcmp.gt.f32.partialorder %v1676_v51, 0.0  ;;  %v1684_v45 = vmul.f32 0.2, %v1676_v51 }
 0x19a   :  { %v1629_v53 = vsel %vm1628_vm10, %v3156_v18, %v1625_v47 }
 0x19b   :  { %v1651_v55 = vmul.f32 %v1629_v53, %v3366_v35  ;;  %v1595_v56 = vadd.f32 %v1594_v50, %v1593_v43  ;;  %v1688_v57 = vsel %vm1680_vm11, %v1676_v51, %v1684_v45  ;;  %v3141_v35 = vld [vmem:[%s3474_s3 + $0xe8] sm:$0xff] }
 0x19c   :  { %v1532_v52 = vpop.f32.mrf.mxu3  ;;  %1956 = vmatmul.f32.vlgmr.msra.gmra.mxu0 %v1688_v57  ;;  %1986 = vmatpush.bf16.msra.mxu3 %v3141_v35 }
 0x19d   :  { %v1533_v54 = vadd.f32 %v1532_v52, %v1521_v48  ;;  %v1664_v61 = vmul.f32 %v1656_v20, %v1651_v55  ;;  %v1604_v62 = vmul.f32 %v1595_v56, %v3333_v11  ;;  %v1671_v52 = vperm.slane %v3416_v24, 3  ;;  %v64_v55 = vld [vmem:[%s3475_s4 + $0x4] ss:$0 sm:$0xff] }
 0x19f   :  { %v1553_v59 = vrot.slane %v1533_v54, 4  ;;  %v1608_v0 = vadd.f32 1e-05, %v1604_v62  ;;  %v1677_v1 = vadd.f32 %v1669_v58, %v1664_v61 }
 0x1a0   :  { %1987 = vmatpush.bf16.msra.mxu3 %v3140_v7 }
 0x1a1   :  { %v1554_v63 = vadd.f32 %v1553_v59, %v1533_v54  ;;  %3157 = vrsqrt.f32 %v1608_v0  ;;  %vm1681_vm12 = vcmp.gt.f32.partialorder %v1677_v1, 0.0  ;;  %v1685_v3 = vmul.f32 0.2, %v1677_v1 }
 0x1a2   :  { %vm1636_vm14 = vweird.f32 %v1608_v0 }
 0x1a3   :  { %v1555_v2 = vrot.slane %v1554_v63, 2  ;;  %v1689_v5 = vsel %vm1681_vm12, %v1677_v1, %v1685_v3  ;;  %v1999_v1 = vld [vmem:[%s3476_s5] sm:$0xff] }
 0x1a4   :  { %1968 = vmatmul.f32.vlgmr.msra.gmra.mxu1 %v1689_v5  ;;  %1988 = vmatpush.bf16.msra.mxu3 %v3139_v12 }
 0x1a5   :  { %v1556_v4 = vadd.f32 %v1555_v2, %v1554_v63 }
 0x1a7   :  { %v1557_v6 = vrot.slane %v1556_v4, 1  ;;  %v3158_v9 = vpop.eup %3157 }
 0x1a8   :  { %v1631_v10 = vmul.f32 %v3158_v9, %v1608_v0  ;;  %vm1637_vm13 = vweird.f32 %v3158_v9  ;;  %1989 = vmatpush.bf16.msra.mxu3 %v3138_v32 }
 0x1a9   :  { %v1558_v8 = vadd.f32 %v1557_v6, %v1556_v4  ;;  %vm1638_vm15 = vmor %vm1636_vm14, %vm1637_vm13 }
 0x1aa   :  { %v1632_v14 = vmul.f32 %v3158_v9, %v1631_v10 }
 0x1ab   :  { %v1569_v13 = vmul.f32 %v3333_v11, %v1558_v8 }
 0x1ac   :  { %v1633_v18 = vmul.f32 0.5, %v1632_v14  ;;  %1990 = vmatpush.bf16.msra.mxu3 %v3137_v26 }
 0x1ad   :  { %v1573_v17 = vsub.f32 %v1533_v54, %v1569_v13 }
 0x1ae   :  { %v1634_v22 = vsub.f32 1.5, %v1633_v18 }
 0x1af   :  { %v1577_v19 = vmul.f32 %v1573_v17, %v1573_v17 }
 0x1b0   :  { %v1635_v46 = vmul.f32 %v3158_v9, %v1634_v22  ;;  %1991 = vmatpush.bf16.msra.mxu3 %v3136_v30 }
 0x1b1   :  { %v1596_v23 = vrot.slane %v1577_v19, 4 }
 0x1b2   :  { %v1639_v28 = vsel %vm1638_vm15, %v3158_v9, %v1635_v46 }
 0x1b3   :  { %v1597_v25 = vadd.f32 %v1596_v23, %v1577_v19  ;;  %v1652_v31 = vmul.f32 %v1639_v28, %v3400_v15 }
 0x1b5   :  { %v1598_v29 = vrot.slane %v1597_v25, 2  ;;  %v1665_v39 = vmul.f32 %v1657_v27, %v1652_v31 }
 0x1b7   :  { %v1599_v34 = vadd.f32 %v1598_v29, %v1597_v25  ;;  %v1678_v44 = vadd.f32 %v1670_v33, %v1665_v39 }
 0x1b9   :  { %v1600_v36 = vrot.slane %v1599_v34, 1  ;;  %vm1682_vm0 = vcmp.gt.f32.partialorder %v1678_v44, 0.0  ;;  %v1686_v38 = vmul.f32 0.2, %v1678_v44 }
 0x1bb   :  { %v1601_v37 = vadd.f32 %v1600_v36, %v1599_v34  ;;  %v1690_v41 = vsel %vm1682_vm0, %v1678_v44, %v1686_v38 }
 0x1bc   :  { %1980 = vmatmul.f32.vlgmr.msra.gmra.mxu2 %v1690_v41 }
 0x1bd   :  { %v1605_v40 = vmul.f32 %v1601_v37, %v3333_v11 }
 0x1bf   :  { %v1609_v42 = vadd.f32 1e-05, %v1605_v40 }
 0x1c1   :  { %3159 = vrsqrt.f32 %v1609_v42  ;;  %vm1646_vm2 = vweird.f32 %v1609_v42 }
 0x1c7   :  { %v3160_v43 = vpop.eup %3159 }
 0x1c8   :  { %v1641_v51 = vmul.f32 %v3160_v43, %v1609_v42  ;;  %vm1647_vm1 = vweird.f32 %v3160_v43 }
 0x1c9   :  { %vm1648_vm3 = vmor %vm1646_vm2, %vm1647_vm1 }
 0x1ca   :  { %v1642_v21 = vmul.f32 %v3160_v43, %v1641_v51 }
 0x1cc   :  { %v1643_v15 = vmul.f32 0.5, %v1642_v21 }
 0x1ce   :  { %v1644_v47 = vsub.f32 1.5, %v1643_v15 }
 0x1d0   :  { %v1645_v48 = vmul.f32 %v3160_v43, %v1644_v47 }
 0x1d2   :  { %v1649_v20 = vsel %vm1648_vm3, %v3160_v43, %v1645_v48 }
 0x1d3   :  { %v1653_v50 = vmul.f32 %v1649_v20, %v1573_v17 }
 0x1d5   :  { %v1666_v11 = vmul.f32 %v1658_v49, %v1653_v50 }
 0x1d7   :  { %v1679_v45 = vadd.f32 %v1671_v52, %v1666_v11 }
 0x1d9   :  { %vm1683_vm4 = vcmp.gt.f32.partialorder %v1679_v45, 0.0  ;;  %v1687_v53 = vmul.f32 0.2, %v1679_v45 }
 0x1db   :  { %v1691_v54 = vsel %vm1683_vm4, %v1679_v45, %v1687_v53 }
 0x1dc   :  { %1992 = vmatmul.f32.vlgmr.msra.gmra.mxu3 %v1691_v54 }
 0x219   :  { %v1957_v56 = vpop.f32.mrf.mxu0 }
 0x21a   :  { %v1958_v58 = vadd.f32 %v1957_v56, %v64_v55 }
 0x221   :  { %v1969_v57 = vpop.f32.mrf.mxu1 }
 0x222   :  { %v1970_v60 = vadd.f32 %v1969_v57, %v1958_v58 }
 0x23f   :  { %v1981_v59 = vpop.f32.mrf.mxu2 }
 0x240   :  { %v1982_v16 = vadd.f32 %v1981_v59, %v1970_v60 }
 0x25f   :  { %v1993_v61 = vpop.f32.mrf.mxu3 }
 0x260   :  { %v1994_v62 = vadd.f32 %v1993_v61, %v1982_v16 }
 0x262   :  { %v1996_v63 = vmul.f32 0.5, %v1994_v62 }
 0x264   :  { %v1997_v24 = vmul.f32 1.442695, %v1996_v63 }
 0x266   :  { %3161 = vpow2.f32 %v1997_v24 }
 0x26c   :  { %v3162_v0 = vpop.eup %3161 }
 0x26d   :  { %2001 = vrot.lane.b32.xlu0 %v3162_v0, %s3220_s29 }
 0x275   :  { %2007 = vrot.lane.b32.xlu0 %v1994_v62, %s3221_s30 }
 0x2df   :  { %v2002_v2 = vpop.permute.xlu0 %2001 }
 0x2e0   :  { %v2004_v35 = vmul.f32 %v2002_v2, %v1999_v1 }
 0x2e2   :  { %v2005_v3 = vadd.f32 %v2004_v35, %v1994_v62 }
 0x2e7   :  { %v2008_v4 = vpop.permute.xlu0 %2007 }
 0x2e8   :  { %v2011_v5 = vsel %vm2010_vm5, %v2005_v3, %v2008_v4 }
 0x2e9   :  { %v2013_v6 = vsel %vm2012_vm6, %v2011_v5, 0.0 }
 0x2ea   :  { %2014 = vst [vmem:[%s3477_s6] sm:$0xff] %v2013_v6 }
 0x2eb   :  { %2019 = vsyncpa [#allocation3], 1 }
 0x2ec   :  { %2020 = vsyncpa [#allocation5], 1 }

</bundles_post_ra>
